<compile_context>
chip_gen: v7x
topology: tpu7x:2x2x1
jax: 0.10.0
libtpu: 0.0.40
codegen_flags: <defaults>
</compile_context>

<pallas_src>
import jax
import jax.numpy as jnp
from jax.experimental import pallas as pl
from jax.experimental.pallas import tpu as pltpu

# ---- model configuration (CloseLayer hardcodes channels*31*31) --------------
CHANNELS = 4                    # small per instructions (module default 12)
H = W = 31                      # CloseLayer requires 31x31 spatial
D = CHANNELS * H * W            # fc1 input features = 3844
HIDDEN = 32
NCLASS = 10
LANES = 128                     # pad only the class/output dim to a full vreg
BATCH = 8                       # small, sublane-aligned batch
BATCH_TILE = 8                  # rows per grid step
NEG_BIG = -1e30                 # bias for padded class lanes (kills them in softmax)


# -----------------------------------------------------------------------------
# Kernel: fc1 -> relu -> fc2 -> log_softmax, lane-dense output
# -----------------------------------------------------------------------------
def close_kernel(xf_ref, w1_ref, b1_ref, w2_ref, b2_ref, out_ref):
    # fc1 + relu: (tile, D) @ (D, 32) -> (tile, 32)
    h = jnp.dot(xf_ref[...], w1_ref[...], preferred_element_type=jnp.float32)
    h = jnp.maximum(h + b1_ref[...], 0.0)
    # fc2: (tile, 32) @ (32, 128) -> (tile, 128).  Padded class columns have
    # zero weights and a -1e30 bias, so their logits are ~-1e30.
    logits = jnp.dot(h, w2_ref[...], preferred_element_type=jnp.float32) + b2_ref[...]
    # Numerically stable log_softmax over the 128-lane dim; padded lanes never
    # win the max and contribute exp(-huge) == 0 to the sum.
    m = jnp.max(logits, axis=-1, keepdims=True)
    s = logits - m
    lse = jnp.log(jnp.sum(jnp.exp(s), axis=-1, keepdims=True))
    out_ref[...] = s - lse


def close_layer(x, w1, b1, w2p, b2p):
    """CloseLayer forward.  x: (N, C, 31, 31) float32.  Returns (N, 10) log-probs."""
    N = x.shape[0]
    xf = x.reshape(N, -1)                        # torch.flatten(x, 1)  (glue)
    n_pad = (-N) % BATCH_TILE                    # pad ragged batches to the tile
    if n_pad:
        xf = jnp.pad(xf, ((0, n_pad), (0, 0)))
    npad = xf.shape[0]

    cost = pl.CostEstimate(
        flops=2 * npad * D * HIDDEN + 2 * npad * HIDDEN * LANES,
        transcendentals=npad * (LANES + 1),      # exp over lanes + log per row
        bytes_accessed=4 * (npad * D + D * HIDDEN + HIDDEN
                            + HIDDEN * LANES + LANES + npad * LANES),
    )

    out_pad = pl.pallas_call(
        close_kernel,
        out_shape=jax.ShapeDtypeStruct((npad, LANES), jnp.float32),
        grid_spec=pltpu.PrefetchScalarGridSpec(
            num_scalar_prefetch=0,
            grid=(npad // BATCH_TILE,),
            in_specs=[
                pl.BlockSpec((BATCH_TILE, D), lambda i: (i, 0)),   # activations
                pl.BlockSpec((D, HIDDEN), lambda i: (0, 0)),       # w1 (resident)
                pl.BlockSpec((1, HIDDEN), lambda i: (0, 0)),       # b1
                pl.BlockSpec((HIDDEN, LANES), lambda i: (0, 0)),   # w2 (class-padded)
                pl.BlockSpec((1, LANES), lambda i: (0, 0)),        # b2 (class-padded)
            ],
            out_specs=pl.BlockSpec((BATCH_TILE, LANES), lambda i: (i, 0)),
        ),
        compiler_params=pltpu.CompilerParams(
            dimension_semantics=("parallel",),   # batch tiles -> both TCs on v7x
        ),
        cost_estimate=cost,
    )(xf, w1, b1, w2p, b2p)
    return out_pad[:N, :NCLASS]                  # drop batch + lane padding


@jax.jit
def close_forward(x, params):
    return close_layer(x, params["w1"], params["b1r"], params["w2p"], params["b2p"])


# -----------------------------------------------------------------------------
# Parameter construction (nn.Linear-style shapes; only the class dim is padded)
# -----------------------------------------------------------------------------
def init_params(key):
    k1, k2, k3, k4 = jax.random.split(key, 4)
    w1 = jax.random.normal(k1, (D, HIDDEN), jnp.float32) * (1.0 / D ** 0.5)
    b1 = jax.random.normal(k2, (HIDDEN,), jnp.float32) * 0.05
    w2 = jax.random.normal(k3, (HIDDEN, NCLASS), jnp.float32) * (1.0 / HIDDEN ** 0.5)
    b2 = jax.random.normal(k4, (NCLASS,), jnp.float32) * 0.05

    # Kernel-side layouts (done once, outside the hot path).
    b1r = b1.reshape(1, HIDDEN)
    w2p = jnp.zeros((HIDDEN, LANES), jnp.float32).at[:, :NCLASS].set(w2)
    b2p = jnp.full((1, LANES), NEG_BIG, jnp.float32).at[0, :NCLASS].set(b2)

    return {"w1": w1, "b1": b1, "w2": w2, "b2": b2,
            "b1r": b1r, "w2p": w2p, "b2p": b2p}


def reference_forward(x, params):
    xf = x.reshape(x.shape[0], -1)
    h = jnp.maximum(xf @ params["w1"] + params["b1"], 0.0)
    logits = h @ params["w2"] + params["b2"]
    return jax.nn.log_softmax(logits, axis=-1)


if __name__ == "__main__":
    key = jax.random.PRNGKey(0)
    pkey, xkey = jax.random.split(key)
    params = init_params(pkey)

    # Input consistent with the module: (N, channels, 31, 31)
    x = jax.random.normal(xkey, (BATCH, CHANNELS, H, W), jnp.float32)

    out = close_forward(x, params)
    jax.block_until_ready(out)

    assert out.shape == (BATCH, NCLASS)
    assert bool(jnp.all(jnp.isfinite(out)))
    # log-probs must exponentiate-sum to 1 per row
    assert bool(jnp.allclose(jnp.sum(jnp.exp(out), axis=-1), 1.0, atol=1e-4))
    # match the pure-JAX reference (loose tol for MXU accumulation differences)
    ref = reference_forward(x, params)
    assert bool(jnp.allclose(out, ref, atol=2e-2, rtol=2e-2))

    print("KERNEL_OK")
</pallas_src>

<mosaic_0001>
module attributes {stable_mosaic.version = 11 : i64} {
  func.func @close_kernel(%arg0: i32, %arg1: memref<8x3844xf32, #tpu.memory_space<vmem>>, %arg2: memref<3844x32xf32, #tpu.memory_space<vmem>>, %arg3: memref<1x32xf32, #tpu.memory_space<vmem>>, %arg4: memref<32x128xf32, #tpu.memory_space<vmem>>, %arg5: memref<1x128xf32, #tpu.memory_space<vmem>>, %arg6: memref<8x128xf32, #tpu.memory_space<vmem>>) attributes {dimension_semantics = [#tpu.dimension_semantics<parallel>], iteration_bounds = array<i64: 1>, scalar_prefetch = 0 : i64, scratch_operands = 0 : i64, tpu.core_type = #tpu.core_type<tc>, window_params = [{transform_indices = @transform_0, window_bounds = array<i64: 8, 3844>}, {pipeline_mode = #tpu.pipeline_mode<synchronous>, transform_indices = @transform_1, window_bounds = array<i64: 3844, 32>}, {pipeline_mode = #tpu.pipeline_mode<synchronous>, transform_indices = @transform_2, window_bounds = array<i64: 1, 32>}, {pipeline_mode = #tpu.pipeline_mode<synchronous>, transform_indices = @transform_3, window_bounds = array<i64: 32, 128>}, {pipeline_mode = #tpu.pipeline_mode<synchronous>, transform_indices = @transform_4, window_bounds = array<i64: 1, 128>}, {transform_indices = @transform_5, window_bounds = array<i64: 8, 128>}]} {
    %c0 = arith.constant 0 : index
    %c0_0 = arith.constant 0 : index
    %0 = vector.load %arg1[%c0, %c0_0] : memref<8x3844xf32, #tpu.memory_space<vmem>>, vector<8x3844xf32>
    %c0_1 = arith.constant 0 : index
    %c0_2 = arith.constant 0 : index
    %1 = vector.load %arg2[%c0_1, %c0_2] : memref<3844x32xf32, #tpu.memory_space<vmem>>, vector<3844x32xf32>
    %cst = arith.constant dense<0.000000e+00> : vector<8x32xf32>
    %2 = tpu.matmul %0, %1, %cst {dimension_numbers = #tpu.dot_dimension_numbers<[1], [0], [0], [1], [0, 0, 1, 1], [], []>} : vector<8x3844xf32>, vector<3844x32xf32>, vector<8x32xf32> -> vector<8x32xf32>
    %c0_3 = arith.constant 0 : index
    %c0_4 = arith.constant 0 : index
    %3 = vector.load %arg3[%c0_3, %c0_4] : memref<1x32xf32, #tpu.memory_space<vmem>>, vector<1x32xf32>
    %4 = vector.broadcast %3 : vector<1x32xf32> to vector<8x32xf32>
    %5 = arith.addf %2, %4 : vector<8x32xf32>
    %cst_5 = arith.constant 0.000000e+00 : f32
    %6 = vector.broadcast %cst_5 : f32 to vector<8x32xf32>
    %7 = arith.maximumf %5, %6 : vector<8x32xf32>
    %c0_6 = arith.constant 0 : index
    %c0_7 = arith.constant 0 : index
    %8 = vector.load %arg4[%c0_6, %c0_7] : memref<32x128xf32, #tpu.memory_space<vmem>>, vector<32x128xf32>
    %cst_8 = arith.constant dense<0.000000e+00> : vector<8x128xf32>
    %9 = tpu.matmul %7, %8, %cst_8 {dimension_numbers = #tpu.dot_dimension_numbers<[1], [0], [0], [1], [0, 0, 1, 1], [], []>} : vector<8x32xf32>, vector<32x128xf32>, vector<8x128xf32> -> vector<8x128xf32>
    %c0_9 = arith.constant 0 : index
    %c0_10 = arith.constant 0 : index
    %10 = vector.load %arg5[%c0_9, %c0_10] : memref<1x128xf32, #tpu.memory_space<vmem>>, vector<1x128xf32>
    %11 = vector.broadcast %10 : vector<1x128xf32> to vector<8x128xf32>
    %12 = arith.addf %9, %11 : vector<8x128xf32>
    %cst_11 = arith.constant dense<0xFF800000> : vector<8xf32>
    %13 = vector.multi_reduction <maximumf>, %12, %cst_11 [1] : vector<8x128xf32> to vector<8xf32>
    %14 = vector.shape_cast %13 : vector<8xf32> to vector<8x1xf32>
    %15 = vector.broadcast %14 : vector<8x1xf32> to vector<8x128xf32>
    %16 = arith.subf %12, %15 : vector<8x128xf32>
    %17 = math.exp %16 : vector<8x128xf32>
    %cst_12 = arith.constant dense<0.000000e+00> : vector<8xf32>
    %18 = vector.multi_reduction <add>, %17, %cst_12 [1] : vector<8x128xf32> to vector<8xf32>
    %19 = vector.shape_cast %18 : vector<8xf32> to vector<8x1xf32>
    %20 = math.log %19 : vector<8x1xf32>
    %21 = vector.broadcast %20 : vector<8x1xf32> to vector<8x128xf32>
    %22 = arith.subf %16, %21 : vector<8x128xf32>
    %c0_13 = arith.constant 0 : index
    %c0_14 = arith.constant 0 : index
    %23 = vector.load %arg6[%c0_13, %c0_14] : memref<8x128xf32, #tpu.memory_space<vmem>>, vector<8x128xf32>
    tpu.vector_store %arg6[%c0_13, %c0_14], %22 {strides = array<i32>} : memref<8x128xf32, #tpu.memory_space<vmem>>, vector<8x128xf32>,
    return
  }
  func.func @transform_0(%arg0: i32) -> (i32, i32) {
    %c0_i32 = arith.constant 0 : i32
    %c0_i32_0 = arith.constant 0 : i32
    return %arg0, %c0_i32 : i32, i32
  }
  func.func @transform_1(%arg0: i32) -> (i32, i32) {
    %c0_i32 = arith.constant 0 : i32
    %c0_i32_0 = arith.constant 0 : i32
    %c0_i32_1 = arith.constant 0 : i32
    return %c0_i32, %c0_i32_0 : i32, i32
  }
  func.func @transform_2(%arg0: i32) -> (i32, i32) {
    %c0_i32 = arith.constant 0 : i32
    %c0_i32_0 = arith.constant 0 : i32
    %c0_i32_1 = arith.constant 0 : i32
    return %c0_i32, %c0_i32_0 : i32, i32
  }
  func.func @transform_3(%arg0: i32) -> (i32, i32) {
    %c0_i32 = arith.constant 0 : i32
    %c0_i32_0 = arith.constant 0 : i32
    %c0_i32_1 = arith.constant 0 : i32
    return %c0_i32, %c0_i32_0 : i32, i32
  }
  func.func @transform_4(%arg0: i32) -> (i32, i32) {
    %c0_i32 = arith.constant 0 : i32
    %c0_i32_0 = arith.constant 0 : i32
    %c0_i32_1 = arith.constant 0 : i32
    return %c0_i32, %c0_i32_0 : i32, i32
  }
  func.func @transform_5(%arg0: i32) -> (i32, i32) {
    %c0_i32 = arith.constant 0 : i32
    %c0_i32_0 = arith.constant 0 : i32
    return %arg0, %c0_i32 : i32, i32
  }
}

</mosaic_0001>

<bundles_post_ra>
// kernel: close_forward.1
= control target key start
LH: loop header
LB: loop body
LE: loop exit
PB: predicated region body
PF: predicated region fallthrough
CT: control target
= control target key end

     0   :  { %s4450_s0 = inlined_call_operand.vmem [shape: f32[8,3844], index: 0, kind: input, shape index: {}]   ;;  %s4451_s1 = inlined_call_operand.vmem [shape: f32[3844,32], index: 1, kind: input, shape index: {}]   ;;  %s4452_s2 = inlined_call_operand.vmem [shape: f32[1,32], index: 2, kind: input, shape index: {}]   ;;  %s4453_s3 = inlined_call_operand.vmem [shape: f32[32,128], index: 3, kind: input, shape index: {}]   ;;  %s4454_s4 = inlined_call_operand.vmem [shape: f32[1,128], index: 4, kind: input, shape index: {}]   ;;  %s4455_s5 = inlined_call_operand.hbm [shape: f32[8,128], index: 5, kind: output, shape index: {}]  }
   0x1   :  { %v68_v0 = vld [vmem:[%s4451_s1 + $0x80] sm:$0xff]  ;;  %v69_v1 = vld [vmem:[%s4451_s1 + $0x88] sm:$0xff]  ;;  %v70_v11 = vld [vmem:[%s4451_s1 + $0x90] sm:$0xff] }
   0x2   :  { %v52_v2 = vld [vmem:[%s4451_s1] sm:$0xff]  ;;  %v2332_v3 = vpack.c.bf16 %v69_v1, %v68_v0  ;;  %v53_v4 = vld [vmem:[%s4451_s1 + $0x8] sm:$0xff]  ;;  %v71_v13 = vld [vmem:[%s4451_s1 + $0x98] sm:$0xff] }
   0x3   :  { %v100_v5 = vld [vmem:[%s4451_s1 + $0x180] sm:$0xff]  ;;  %v101_v6 = vld [vmem:[%s4451_s1 + $0x188] sm:$0xff]  ;;  %v2334_v7 = vpack.c.bf16 %v53_v4, %v52_v2  ;;  %v54_v14 = vld [vmem:[%s4451_s1 + $0x10] sm:$0xff]  ;;  %v2336_v16 = vpack.c.bf16 %v71_v13, %v70_v11 }
   0x4   :  { %v2364_v8 = vpack.c.bf16 %v101_v6, %v100_v5  ;;  %v84_v9 = vld [vmem:[%s4451_s1 + $0x100] sm:$0xff]  ;;  %v85_v10 = vld [vmem:[%s4451_s1 + $0x108] sm:$0xff]  ;;  %2333 = vmatprep.subr.bf16.mxu0 %v2332_v3  ;;  %v55_v15 = vld [vmem:[%s4451_s1 + $0x18] sm:$0xff] }
   0x5   :  { %v2366_v12 = vpack.c.bf16 %v85_v10, %v84_v9  ;;  %2335 = vmatpush3.bf16.msra.mxu0 %v2334_v7  ;;  %v2338_v17 = vpack.c.bf16 %v55_v15, %v54_v14  ;;  %v102_v18 = vld [vmem:[%s4451_s1 + $0x190] sm:$0xff]  ;;  %v103_v19 = vld [vmem:[%s4451_s1 + $0x198] sm:$0xff]  ;;  %v72_v23 = vld [vmem:[%s4451_s1 + $0xa0] sm:$0xff] }
   0x6   :  { %2365 = vmatprep.subr.bf16.mxu1 %v2364_v8  ;;  %v86_v20 = vld [vmem:[%s4451_s1 + $0x110] sm:$0xff]  ;;  %v2368_v21 = vpack.c.bf16 %v103_v19, %v102_v18  ;;  %v87_v22 = vld [vmem:[%s4451_s1 + $0x118] sm:$0xff]  ;;  %v73_v24 = vld [vmem:[%s4451_s1 + $0xa8] sm:$0xff]  ;;  %2337 = vmatprep.subr.bf16.mxu0 %v2336_v16 }
   0x7   :  { %2367 = vmatpush3.bf16.msra.mxu1 %v2366_v12  ;;  %v2370_v25 = vpack.c.bf16 %v87_v22, %v86_v20  ;;  %v2340_v26 = vpack.c.bf16 %v73_v24, %v72_v23  ;;  %v56_v27 = vld [vmem:[%s4451_s1 + $0x20] sm:$0xff]  ;;  %v57_v28 = vld [vmem:[%s4451_s1 + $0x28] sm:$0xff]  ;;  %v74_v35 = vld [vmem:[%s4451_s1 + $0xb0] sm:$0xff] }
   0x8   :  { %v104_v29 = vld [vmem:[%s4451_s1 + $0x1a0] sm:$0xff]  ;;  %2369 = vmatprep.subr.bf16.mxu1 %v2368_v21  ;;  %v105_v30 = vld [vmem:[%s4451_s1 + $0x1a8] sm:$0xff]  ;;  %v2342_v33 = vpack.c.bf16 %v57_v28, %v56_v27  ;;  %v75_v36 = vld [vmem:[%s4451_s1 + $0xb8] sm:$0xff] }
   0x9   :  { %v88_v31 = vld [vmem:[%s4451_s1 + $0x120] sm:$0xff]  ;;  %v89_v32 = vld [vmem:[%s4451_s1 + $0x128] sm:$0xff]  ;;  %2339 = vmatpush3.bf16.msra.mxu0 %v2338_v17  ;;  %v2372_v34 = vpack.c.bf16 %v105_v30, %v104_v29  ;;  %v58_v37 = vld [vmem:[%s4451_s1 + $0x30] sm:$0xff]  ;;  %v2344_v39 = vpack.c.bf16 %v75_v36, %v74_v35 }
   0xa   :  { %2341 = vmatprep.subr.bf16.mxu0 %v2340_v26  ;;  %v2374_v38 = vpack.c.bf16 %v89_v32, %v88_v31  ;;  %v59_v40 = vld [vmem:[%s4451_s1 + $0x38] sm:$0xff]  ;;  %v106_v41 = vld [vmem:[%s4451_s1 + $0x1b0] sm:$0xff]  ;;  %v76_v46 = vld [vmem:[%s4451_s1 + $0xc0] sm:$0xff] }
   0xb   :  { %2371 = vmatpush3.bf16.msra.mxu1 %v2370_v25  ;;  %v107_v42 = vld [vmem:[%s4451_s1 + $0x1b8] sm:$0xff]  ;;  %v90_v44 = vld [vmem:[%s4451_s1 + $0x130] sm:$0xff]  ;;  %v77_v47 = vld [vmem:[%s4451_s1 + $0xc8] sm:$0xff]  ;;  %v2346_v48 = vpack.c.bf16 %v59_v40, %v58_v37 }
   0xc   :  { %2373 = vmatprep.subr.bf16.mxu1 %v2372_v34  ;;  %v2376_v43 = vpack.c.bf16 %v107_v42, %v106_v41  ;;  %v91_v45 = vld [vmem:[%s4451_s1 + $0x138] sm:$0xff]  ;;  %v108_v49 = vld [vmem:[%s4451_s1 + $0x1c0] sm:$0xff]  ;;  %v109_v50 = vld [vmem:[%s4451_s1 + $0x1c8] sm:$0xff]  ;;  %v2348_v52 = vpack.c.bf16 %v77_v47, %v76_v46 }
   0xd   :  { %2343 = vmatpush3.bf16.msra.mxu0 %v2342_v33  ;;  %v2378_v51 = vpack.c.bf16 %v91_v45, %v90_v44  ;;  %v60_v53 = vld [vmem:[%s4451_s1 + $0x40] sm:$0xff]  ;;  %v61_v54 = vld [vmem:[%s4451_s1 + $0x48] sm:$0xff]  ;;  %v2380_v56 = vpack.c.bf16 %v109_v50, %v108_v49  ;;  %v78_v58 = vld [vmem:[%s4451_s1 + $0xd0] sm:$0xff] }
   0xe   :  { %2345 = vmatprep.subr.bf16.mxu0 %v2344_v39  ;;  %v92_v55 = vld [vmem:[%s4451_s1 + $0x140] sm:$0xff]  ;;  %v93_v57 = vld [vmem:[%s4451_s1 + $0x148] sm:$0xff]  ;;  %v79_v59 = vld [vmem:[%s4451_s1 + $0xd8] sm:$0xff]  ;;  %v2350_v62 = vpack.c.bf16 %v61_v54, %v60_v53 }
   0xf   :  { %2375 = vmatpush3.bf16.msra.mxu1 %v2374_v38  ;;  %v110_v60 = vld [vmem:[%s4451_s1 + $0x1d0] sm:$0xff]  ;;  %v111_v61 = vld [vmem:[%s4451_s1 + $0x1d8] sm:$0xff]  ;;  %v2382_v63 = vpack.c.bf16 %v93_v57, %v92_v55  ;;  %v2352_v0 = vpack.c.bf16 %v79_v59, %v78_v58  ;;  %v80_v6 = vld [vmem:[%s4451_s1 + $0xe0] sm:$0xff] }
  0x10   :  { %2377 = vmatprep.subr.bf16.mxu1 %v2376_v43  ;;  %v62_v1 = vld [vmem:[%s4451_s1 + $0x50] sm:$0xff]  ;;  %v63_v2 = vld [vmem:[%s4451_s1 + $0x58] sm:$0xff]  ;;  %v2384_v4 = vpack.c.bf16 %v111_v61, %v110_v60  ;;  %v81_v7 = vld [vmem:[%s4451_s1 + $0xe8] sm:$0xff] }
  0x11   :  { %2347 = vmatpush3.bf16.msra.mxu0 %v2346_v48  ;;  %v94_v3 = vld [vmem:[%s4451_s1 + $0x150] sm:$0xff]  ;;  %v95_v5 = vld [vmem:[%s4451_s1 + $0x158] sm:$0xff]  ;;  %v112_v8 = vld [vmem:[%s4451_s1 + $0x1e0] sm:$0xff]  ;;  %v2354_v10 = vpack.c.bf16 %v63_v2, %v62_v1  ;;  %v2356_v14 = vpack.c.bf16 %v81_v7, %v80_v6 }
  0x12   :  { %2349 = vmatprep.subr.bf16.mxu0 %v2348_v52  ;;  %v113_v9 = vld [vmem:[%s4451_s1 + $0x1e8] sm:$0xff]  ;;  %v64_v11 = vld [vmem:[%s4451_s1 + $0x60] sm:$0xff]  ;;  %v2386_v13 = vpack.c.bf16 %v95_v5, %v94_v3  ;;  %v82_v19 = vld [vmem:[%s4451_s1 + $0xf0] sm:$0xff] }
  0x13   :  { %2379 = vmatpush3.bf16.msra.mxu1 %v2378_v51  ;;  %v22_v12 = vld [vmem:[%s4450_s0 + $0x8] sm:$0xff]  ;;  %v96_v16 = vld [vmem:[%s4451_s1 + $0x160] sm:$0xff]  ;;  %v2388_v18 = vpack.c.bf16 %v113_v9, %v112_v8  ;;  %v83_v20 = vld [vmem:[%s4451_s1 + $0xf8] sm:$0xff] }
  0x14   :  { %2381 = vmatprep.subr.bf16.mxu1 %v2380_v56  ;;  %v65_v15 = vld [vmem:[%s4451_s1 + $0x68] sm:$0xff]  ;;  %612 = vmatprep.mubr.f32.mxu0 %v22_v12  ;;  %v24_v21 = vld [vmem:[%s4450_s0 + $0x18] sm:$0xff]  ;;  %v114_v22 = vld [vmem:[%s4451_s1 + $0x1f0] sm:$0xff]  ;;  %v2360_v26 = vpack.c.bf16 %v83_v20, %v82_v19 }
  0x15   :  { %2351 = vmatpush3.bf16.msra.mxu0 %v2350_v62  ;;  %v97_v17 = vld [vmem:[%s4451_s1 + $0x168] sm:$0xff]  ;;  %v115_v23 = vld [vmem:[%s4451_s1 + $0x1f8] sm:$0xff]  ;;  %682 = vmatprep.mubr.f32.mxu1 %v24_v21  ;;  %v2358_v24 = vpack.c.bf16 %v65_v15, %v64_v11  ;;  %v66_v27 = vld [vmem:[%s4451_s1 + $0x70] sm:$0xff] }
  0x16   :  { %2353 = vmatprep.subr.bf16.mxu0 %v2352_v0  ;;  %v2390_v25 = vpack.c.bf16 %v97_v17, %v96_v16  ;;  %v67_v28 = vld [vmem:[%s4451_s1 + $0x78] sm:$0xff]  ;;  %v98_v29 = vld [vmem:[%s4451_s1 + $0x170] sm:$0xff]  ;;  %v2392_v30 = vpack.c.bf16 %v115_v23, %v114_v22  ;;  %v132_v32 = vld [vmem:[%s4451_s1 + $0x280] sm:$0xff] }
  0x17   :  { %2383 = vmatpush3.bf16.msra.mxu1 %v2382_v63  ;;  %v99_v31 = vld [vmem:[%s4451_s1 + $0x178] sm:$0xff]  ;;  %v133_v33 = vld [vmem:[%s4451_s1 + $0x288] sm:$0xff]  ;;  %v164_v34 = vld [vmem:[%s4451_s1 + $0x380] sm:$0xff]  ;;  %v2362_v36 = vpack.c.bf16 %v67_v28, %v66_v27 }
  0x18   :  { %2385 = vmatprep.subr.bf16.mxu1 %v2384_v4  ;;  %v165_v35 = vld [vmem:[%s4451_s1 + $0x388] sm:$0xff]  ;;  %v2394_v37 = vpack.c.bf16 %v99_v31, %v98_v29  ;;  %v2396_v38 = vpack.c.bf16 %v133_v33, %v132_v32  ;;  %v116_v39 = vld [vmem:[%s4451_s1 + $0x200] sm:$0xff]  ;;  %v134_v44 = vld [vmem:[%s4451_s1 + $0x290] sm:$0xff] }
  0x19   :  { %2355 = vmatpush3.bf16.msra.mxu0 %v2354_v10  ;;  %v117_v40 = vld [vmem:[%s4451_s1 + $0x208] sm:$0xff]  ;;  %v148_v41 = vld [vmem:[%s4451_s1 + $0x300] sm:$0xff]  ;;  %v2428_v42 = vpack.c.bf16 %v165_v35, %v164_v34  ;;  %v135_v45 = vld [vmem:[%s4451_s1 + $0x298] sm:$0xff] }
  0x1a   :  { %2357 = vmatprep.subr.bf16.mxu0 %v2356_v14  ;;  %v149_v43 = vld [vmem:[%s4451_s1 + $0x308] sm:$0xff]  ;;  %v166_v46 = vld [vmem:[%s4451_s1 + $0x390] sm:$0xff]  ;;  %v167_v47 = vld [vmem:[%s4451_s1 + $0x398] sm:$0xff]  ;;  %v2398_v49 = vpack.c.bf16 %v117_v40, %v116_v39  ;;  %v2400_v52 = vpack.c.bf16 %v135_v45, %v134_v44 }
  0x1b   :  { %2387 = vmatpush3.bf16.msra.mxu1 %v2386_v13  ;;  %v21_v48 = vld [vmem:[%s4450_s0] sm:$0xff]  ;;  %v23_v50 = vld [vmem:[%s4450_s0 + $0x10] sm:$0xff]  ;;  %v2430_v51 = vpack.c.bf16 %v149_v43, %v148_v41  ;;  %v119_v54 = vld [vmem:[%s4451_s1 + $0x218] sm:$0xff]  ;;  %v2432_v56 = vpack.c.bf16 %v167_v47, %v166_v46 }
  0x1c   :  { %2389 = vmatprep.subr.bf16.mxu1 %v2388_v18  ;;  %v118_v53 = vld [vmem:[%s4451_s1 + $0x210] sm:$0xff]  ;;  %v151_v57 = vld [vmem:[%s4451_s1 + $0x318] sm:$0xff]  ;;  %v136_v58 = vld [vmem:[%s4451_s1 + $0x2a0] sm:$0xff] }
  0x1d   :  { %2359 = vmatpush3.bf16.msra.mxu0 %v2358_v24  ;;  %v150_v55 = vld [vmem:[%s4451_s1 + $0x310] sm:$0xff]  ;;  %v137_v59 = vld [vmem:[%s4451_s1 + $0x2a8] sm:$0xff]  ;;  %v168_v60 = vld [vmem:[%s4451_s1 + $0x3a0] sm:$0xff]  ;;  %v2402_v62 = vpack.c.bf16 %v119_v54, %v118_v53 }
  0x1e   :  { %2361 = vmatprep.subr.bf16.mxu0 %v2360_v26  ;;  %v169_v61 = vld [vmem:[%s4451_s1 + $0x3a8] sm:$0xff]  ;;  %v2434_v63 = vpack.c.bf16 %v151_v57, %v150_v55  ;;  %v2404_v0 = vpack.c.bf16 %v137_v59, %v136_v58  ;;  %v120_v1 = vld [vmem:[%s4451_s1 + $0x220] sm:$0xff]  ;;  %v138_v6 = vld [vmem:[%s4451_s1 + $0x2b0] sm:$0xff] }
  0x1f   :  { %2391 = vmatpush3.bf16.msra.mxu1 %v2390_v25  ;;  %v121_v2 = vld [vmem:[%s4451_s1 + $0x228] sm:$0xff]  ;;  %v152_v3 = vld [vmem:[%s4451_s1 + $0x320] sm:$0xff]  ;;  %v2436_v4 = vpack.c.bf16 %v169_v61, %v168_v60  ;;  %v139_v7 = vld [vmem:[%s4451_s1 + $0x2b8] sm:$0xff] }
  0x20   :  { %2393 = vmatprep.subr.bf16.mxu1 %v2392_v30  ;;  %v153_v5 = vld [vmem:[%s4451_s1 + $0x328] sm:$0xff]  ;;  %v170_v8 = vld [vmem:[%s4451_s1 + $0x3b0] sm:$0xff]  ;;  %v171_v9 = vld [vmem:[%s4451_s1 + $0x3b8] sm:$0xff]  ;;  %v2406_v10 = vpack.c.bf16 %v121_v2, %v120_v1  ;;  %v2408_v12 = vpack.c.bf16 %v139_v7, %v138_v6 }
  0x21   :  { %2363 = vmatpush3.bf16.msra.mxu0 %v2362_v36  ;;  %v2438_v11 = vpack.c.bf16 %v153_v5, %v152_v3  ;;  %v122_v13 = vld [vmem:[%s4451_s1 + $0x230] sm:$0xff]  ;;  %v123_v14 = vld [vmem:[%s4451_s1 + $0x238] sm:$0xff]  ;;  %v2440_v16 = vpack.c.bf16 %v171_v9, %v170_v8  ;;  %v140_v18 = vld [vmem:[%s4451_s1 + $0x2c0] sm:$0xff] }
  0x22   :  { %2397 = vmatprep.subr.bf16.mxu0 %v2396_v38  ;;  %v154_v15 = vld [vmem:[%s4451_s1 + $0x330] sm:$0xff]  ;;  %v155_v17 = vld [vmem:[%s4451_s1 + $0x338] sm:$0xff]  ;;  %v141_v19 = vld [vmem:[%s4451_s1 + $0x2c8] sm:$0xff]  ;;  %v2410_v23 = vpack.c.bf16 %v123_v14, %v122_v13 }
  0x23   :  { %2395 = vmatpush3.bf16.msra.mxu1 %v2394_v37  ;;  %v172_v20 = vld [vmem:[%s4451_s1 + $0x3c0] sm:$0xff]  ;;  %v173_v21 = vld [vmem:[%s4451_s1 + $0x3c8] sm:$0xff]  ;;  %v2442_v25 = vpack.c.bf16 %v155_v17, %v154_v15  ;;  %v2412_v26 = vpack.c.bf16 %v141_v19, %v140_v18  ;;  %v28_v29 = vld [vmem:[%s4450_s0 + $0x38] sm:$0xff] }
  0x24   :  { %2429 = vmatprep.subr.bf16.mxu1 %v2428_v42  ;;  %613 = vmatmul.mubr.f32.vlgmr.msra.gmra.mrb[0].mxu0 %v21_v48  ;;  %v26_v22 = vld [vmem:[%s4450_s0 + $0x28] sm:$0xff]  ;;  %v124_v24 = vld [vmem:[%s4451_s1 + $0x240] sm:$0xff]  ;;  %v2444_v30 = vpack.c.bf16 %v173_v21, %v172_v20  ;;  %v142_v32 = vld [vmem:[%s4451_s1 + $0x2d0] sm:$0xff] }
  0x25   :  { %2399 = vmatpush3.bf16.msra.mxu0 %v2398_v49  ;;  %752 = vmatprep.mubr.f32.mxu0 %v26_v22  ;;  %v125_v27 = vld [vmem:[%s4451_s1 + $0x248] sm:$0xff]  ;;  %v156_v28 = vld [vmem:[%s4451_s1 + $0x340] sm:$0xff]  ;;  %v143_v33 = vld [vmem:[%s4451_s1 + $0x2d8] sm:$0xff] }
  0x26   :  { %683 = vmatmul.mubr.f32.vlgmr.msra.gmra.mrb[0].mxu1 %v23_v50  ;;  %2401 = vmatprep.subr.bf16.mxu0 %v2400_v52  ;;  %v157_v31 = vld [vmem:[%s4451_s1 + $0x348] sm:$0xff]  ;;  %v174_v34 = vld [vmem:[%s4451_s1 + $0x3d0] sm:$0xff]  ;;  %v175_v35 = vld [vmem:[%s4451_s1 + $0x3d8] sm:$0xff]  ;;  %v2414_v36 = vpack.c.bf16 %v125_v27, %v124_v24  ;;  %v2416_v38 = vpack.c.bf16 %v143_v33, %v142_v32 }
  0x27   :  { %2431 = vmatpush3.bf16.msra.mxu1 %v2430_v51  ;;  %822 = vmatprep.mubr.f32.mxu1 %v28_v29  ;;  %v2446_v37 = vpack.c.bf16 %v157_v31, %v156_v28  ;;  %v126_v39 = vld [vmem:[%s4451_s1 + $0x250] sm:$0xff]  ;;  %v127_v40 = vld [vmem:[%s4451_s1 + $0x258] sm:$0xff]  ;;  %v2448_v42 = vpack.c.bf16 %v175_v35, %v174_v34  ;;  %v144_v44 = vld [vmem:[%s4451_s1 + $0x2e0] sm:$0xff] }
  0x28   :  { %2433 = vmatprep.subr.bf16.mxu1 %v2432_v56  ;;  %v158_v41 = vld [vmem:[%s4451_s1 + $0x350] sm:$0xff]  ;;  %v159_v43 = vld [vmem:[%s4451_s1 + $0x358] sm:$0xff]  ;;  %v145_v45 = vld [vmem:[%s4451_s1 + $0x2e8] sm:$0xff]  ;;  %v2418_v48 = vpack.c.bf16 %v127_v40, %v126_v39 }
  0x29   :  { %2403 = vmatpush3.bf16.msra.mxu0 %v2402_v62  ;;  %v176_v46 = vld [vmem:[%s4451_s1 + $0x3e0] sm:$0xff]  ;;  %v177_v47 = vld [vmem:[%s4451_s1 + $0x3e8] sm:$0xff]  ;;  %v2450_v49 = vpack.c.bf16 %v159_v43, %v158_v41  ;;  %v2420_v50 = vpack.c.bf16 %v145_v45, %v144_v44  ;;  %v146_v56 = vld [vmem:[%s4451_s1 + $0x2f0] sm:$0xff] }
  0x2a   :  { %2405 = vmatprep.subr.bf16.mxu0 %v2404_v0  ;;  %v128_v51 = vld [vmem:[%s4451_s1 + $0x260] sm:$0xff]  ;;  %v129_v52 = vld [vmem:[%s4451_s1 + $0x268] sm:$0xff]  ;;  %v2452_v54 = vpack.c.bf16 %v177_v47, %v176_v46  ;;  %v147_v57 = vld [vmem:[%s4451_s1 + $0x2f8] sm:$0xff] }
  0x2b   :  { %2435 = vmatpush3.bf16.msra.mxu1 %v2434_v63  ;;  %v160_v53 = vld [vmem:[%s4451_s1 + $0x360] sm:$0xff]  ;;  %v161_v55 = vld [vmem:[%s4451_s1 + $0x368] sm:$0xff]  ;;  %v178_v58 = vld [vmem:[%s4451_s1 + $0x3f0] sm:$0xff]  ;;  %v2422_v60 = vpack.c.bf16 %v129_v52, %v128_v51  ;;  %v2424_v62 = vpack.c.bf16 %v147_v57, %v146_v56 }
  0x2c   :  { %2437 = vmatprep.subr.bf16.mxu1 %v2436_v4  ;;  %v179_v59 = vld [vmem:[%s4451_s1 + $0x3f8] sm:$0xff]  ;;  %v2454_v61 = vpack.c.bf16 %v161_v55, %v160_v53  ;;  %v130_v63 = vld [vmem:[%s4451_s1 + $0x270] sm:$0xff]  ;;  %v196_v4 = vld [vmem:[%s4451_s1 + $0x480] sm:$0xff] }
  0x2d   :  { %2407 = vmatpush3.bf16.msra.mxu0 %v2406_v10  ;;  %v131_v0 = vld [vmem:[%s4451_s1 + $0x278] sm:$0xff]  ;;  %v162_v1 = vld [vmem:[%s4451_s1 + $0x370] sm:$0xff]  ;;  %v2456_v2 = vpack.c.bf16 %v179_v59, %v178_v58  ;;  %v197_v5 = vld [vmem:[%s4451_s1 + $0x488] sm:$0xff] }
  0x2e   :  { %2409 = vmatprep.subr.bf16.mxu0 %v2408_v12  ;;  %v163_v3 = vld [vmem:[%s4451_s1 + $0x378] sm:$0xff]  ;;  %v228_v6 = vld [vmem:[%s4451_s1 + $0x580] sm:$0xff]  ;;  %v229_v7 = vld [vmem:[%s4451_s1 + $0x588] sm:$0xff]  ;;  %v2426_v8 = vpack.c.bf16 %v131_v0, %v130_v63  ;;  %v2460_v10 = vpack.c.bf16 %v197_v5, %v196_v4 }
  0x2f   :  { %2439 = vmatpush3.bf16.msra.mxu1 %v2438_v11  ;;  %v2458_v9 = vpack.c.bf16 %v163_v3, %v162_v1  ;;  %v180_v11 = vld [vmem:[%s4451_s1 + $0x400] sm:$0xff]  ;;  %v181_v12 = vld [vmem:[%s4451_s1 + $0x408] sm:$0xff]  ;;  %v2492_v14 = vpack.c.bf16 %v229_v7, %v228_v6  ;;  %v199_v17 = vld [vmem:[%s4451_s1 + $0x498] sm:$0xff] }
  0x30   :  { %2441 = vmatprep.subr.bf16.mxu1 %v2440_v16  ;;  %v212_v13 = vld [vmem:[%s4451_s1 + $0x500] sm:$0xff]  ;;  %v213_v15 = vld [vmem:[%s4451_s1 + $0x508] sm:$0xff]  ;;  %v198_v16 = vld [vmem:[%s4451_s1 + $0x490] sm:$0xff]  ;;  %v2462_v21 = vpack.c.bf16 %v181_v12, %v180_v11 }
  0x31   :  { %2411 = vmatpush3.bf16.msra.mxu0 %v2410_v23  ;;  %v230_v18 = vld [vmem:[%s4451_s1 + $0x590] sm:$0xff]  ;;  %v231_v19 = vld [vmem:[%s4451_s1 + $0x598] sm:$0xff]  ;;  %v25_v20 = vld [vmem:[%s4450_s0 + $0x20] sm:$0xff]  ;;  %v2494_v23 = vpack.c.bf16 %v213_v15, %v212_v13  ;;  %v2464_v24 = vpack.c.bf16 %v199_v17, %v198_v16 }
  0x32   :  { %2413 = vmatprep.subr.bf16.mxu0 %v2412_v26  ;;  %v27_v22 = vld [vmem:[%s4450_s0 + $0x30] sm:$0xff]  ;;  %v183_v26 = vld [vmem:[%s4451_s1 + $0x418] sm:$0xff]  ;;  %v2496_v28 = vpack.c.bf16 %v231_v19, %v230_v18  ;;  %v201_v31 = vld [vmem:[%s4451_s1 + $0x4a8] sm:$0xff] }
  0x33   :  { %2443 = vmatpush3.bf16.msra.mxu1 %v2442_v25  ;;  %v182_v25 = vld [vmem:[%s4451_s1 + $0x410] sm:$0xff]  ;;  %v215_v29 = vld [vmem:[%s4451_s1 + $0x518] sm:$0xff]  ;;  %v232_v32 = vld [vmem:[%s4451_s1 + $0x5a0] sm:$0xff] }
  0x34   :  { %2445 = vmatprep.subr.bf16.mxu1 %v2444_v30  ;;  %v214_v27 = vld [vmem:[%s4451_s1 + $0x510] sm:$0xff]  ;;  %v200_v30 = vld [vmem:[%s4451_s1 + $0x4a0] sm:$0xff]  ;;  %v233_v33 = vld [vmem:[%s4451_s1 + $0x5a8] sm:$0xff]  ;;  %v2466_v35 = vpack.c.bf16 %v183_v26, %v182_v25 }
  0x35   :  { %2415 = vmatpush3.bf16.msra.mxu0 %v2414_v36  ;;  %v30_v34 = vld [vmem:[%s4450_s0 + $0x48] sm:$0xff]  ;;  %v32_v36 = vld [vmem:[%s4450_s0 + $0x58] sm:$0xff]  ;;  %v184_v39 = vld [vmem:[%s4451_s1 + $0x420] sm:$0xff] }
  0x36   :  { %2417 = vmatprep.subr.bf16.mxu0 %v2416_v38  ;;  %v2468_v38 = vpack.c.bf16 %v201_v31, %v200_v30  ;;  %v185_v40 = vld [vmem:[%s4451_s1 + $0x428] sm:$0xff]  ;;  %v216_v41 = vld [vmem:[%s4451_s1 + $0x520] sm:$0xff]  ;;  %v202_v44 = vld [vmem:[%s4451_s1 + $0x4b0] sm:$0xff] }
  0x37   :  { %2447 = vmatpush3.bf16.msra.mxu1 %v2446_v37  ;;  %v2498_v37 = vpack.c.bf16 %v215_v29, %v214_v27  ;;  %v217_v43 = vld [vmem:[%s4451_s1 + $0x528] sm:$0xff]  ;;  %v203_v45 = vld [vmem:[%s4451_s1 + $0x4b8] sm:$0xff]  ;;  %v234_v46 = vld [vmem:[%s4451_s1 + $0x5b0] sm:$0xff] }
  0x38   :  { %2449 = vmatprep.subr.bf16.mxu1 %v2448_v42  ;;  %v2500_v42 = vpack.c.bf16 %v233_v33, %v232_v32  ;;  %v235_v47 = vld [vmem:[%s4451_s1 + $0x5b8] sm:$0xff]  ;;  %v186_v51 = vld [vmem:[%s4451_s1 + $0x430] sm:$0xff]  ;;  %v204_v56 = vld [vmem:[%s4451_s1 + $0x4c0] sm:$0xff] }
  0x39   :  { %2419 = vmatpush3.bf16.msra.mxu0 %v2418_v48  ;;  %v2470_v48 = vpack.c.bf16 %v185_v40, %v184_v39  ;;  %v187_v52 = vld [vmem:[%s4451_s1 + $0x438] sm:$0xff]  ;;  %v218_v53 = vld [vmem:[%s4451_s1 + $0x530] sm:$0xff]  ;;  %v205_v57 = vld [vmem:[%s4451_s1 + $0x4c8] sm:$0xff] }
  0x3a   :  { %2421 = vmatprep.subr.bf16.mxu0 %v2420_v50  ;;  %v2472_v50 = vpack.c.bf16 %v203_v45, %v202_v44  ;;  %v219_v55 = vld [vmem:[%s4451_s1 + $0x538] sm:$0xff]  ;;  %v236_v58 = vld [vmem:[%s4451_s1 + $0x5c0] sm:$0xff]  ;;  %v237_v59 = vld [vmem:[%s4451_s1 + $0x5c8] sm:$0xff] }
  0x3b   :  { %2451 = vmatpush3.bf16.msra.mxu1 %v2450_v49  ;;  %v2502_v49 = vpack.c.bf16 %v217_v43, %v216_v41  ;;  %v188_v63 = vld [vmem:[%s4451_s1 + $0x440] sm:$0xff]  ;;  %v189_v0 = vld [vmem:[%s4451_s1 + $0x448] sm:$0xff]  ;;  %v206_v4 = vld [vmem:[%s4451_s1 + $0x4d0] sm:$0xff] }
  0x3c   :  { %2453 = vmatprep.subr.bf16.mxu1 %v2452_v54  ;;  %v2504_v54 = vpack.c.bf16 %v235_v47, %v234_v46  ;;  %v220_v1 = vld [vmem:[%s4451_s1 + $0x540] sm:$0xff]  ;;  %v221_v3 = vld [vmem:[%s4451_s1 + $0x548] sm:$0xff]  ;;  %v207_v5 = vld [vmem:[%s4451_s1 + $0x4d8] sm:$0xff] }
  0x3d   :  { %2423 = vmatpush3.bf16.msra.mxu0 %v2422_v60  ;;  %v2474_v60 = vpack.c.bf16 %v187_v52, %v186_v51  ;;  %v238_v6 = vld [vmem:[%s4451_s1 + $0x5d0] sm:$0xff]  ;;  %v239_v7 = vld [vmem:[%s4451_s1 + $0x5d8] sm:$0xff]  ;;  %v208_v16 = vld [vmem:[%s4451_s1 + $0x4e0] sm:$0xff] }
  0x3e   :  { %2425 = vmatprep.subr.bf16.mxu0 %v2424_v62  ;;  %v2476_v62 = vpack.c.bf16 %v205_v57, %v204_v56  ;;  %v190_v11 = vld [vmem:[%s4451_s1 + $0x450] sm:$0xff]  ;;  %v191_v12 = vld [vmem:[%s4451_s1 + $0x458] sm:$0xff]  ;;  %v209_v17 = vld [vmem:[%s4451_s1 + $0x4e8] sm:$0xff] }
  0x3f   :  { %2455 = vmatpush3.bf16.msra.mxu1 %v2454_v61  ;;  %v2506_v61 = vpack.c.bf16 %v219_v55, %v218_v53  ;;  %v222_v13 = vld [vmem:[%s4451_s1 + $0x550] sm:$0xff]  ;;  %v223_v15 = vld [vmem:[%s4451_s1 + $0x558] sm:$0xff]  ;;  %v240_v18 = vld [vmem:[%s4451_s1 + $0x5e0] sm:$0xff] }
  0x40   :  { %2457 = vmatprep.subr.bf16.mxu1 %v2456_v2  ;;  %v2508_v2 = vpack.c.bf16 %v237_v59, %v236_v58  ;;  %v241_v19 = vld [vmem:[%s4451_s1 + $0x5e8] sm:$0xff]  ;;  %v224_v25 = vld [vmem:[%s4451_s1 + $0x560] sm:$0xff]  ;;  %v211_v29 = vld [vmem:[%s4451_s1 + $0x4f8] sm:$0xff] }
  0x41   :  { %2427 = vmatpush3.bf16.msra.mxu0 %v2426_v8  ;;  %v2478_v8 = vpack.c.bf16 %v189_v0, %v188_v63  ;;  %v2516_v26 = vpack.c.bf16 %v241_v19, %v240_v18  ;;  %v225_v27 = vld [vmem:[%s4451_s1 + $0x568] sm:$0xff]  ;;  %v242_v30 = vld [vmem:[%s4451_s1 + $0x5f0] sm:$0xff]  ;;  %v243_v31 = vld [vmem:[%s4451_s1 + $0x5f8] sm:$0xff] }
  0x42   :  { %2461 = vmatprep.subr.bf16.mxu0 %v2460_v10  ;;  %v2480_v10 = vpack.c.bf16 %v207_v5, %v206_v4  ;;  %v2518_v33 = vpack.c.bf16 %v225_v27, %v224_v25  ;;  %v227_v39 = vld [vmem:[%s4451_s1 + $0x578] sm:$0xff]  ;;  %v260_v40 = vld [vmem:[%s4451_s1 + $0x680] sm:$0xff]  ;;  %v261_v41 = vld [vmem:[%s4451_s1 + $0x688] sm:$0xff] }
  0x43   :  { %2459 = vmatpush3.bf16.msra.mxu1 %v2458_v9  ;;  %v2510_v9 = vpack.c.bf16 %v221_v3, %v220_v1  ;;  %v293_v43 = vld [vmem:[%s4451_s1 + $0x788] sm:$0xff]  ;;  %v2524_v46 = vpack.c.bf16 %v261_v41, %v260_v40  ;;  %v244_v47 = vld [vmem:[%s4451_s1 + $0x600] sm:$0xff]  ;;  %v262_v52 = vld [vmem:[%s4451_s1 + $0x690] sm:$0xff] }
  0x44   :  { %2493 = vmatprep.subr.bf16.mxu1 %v2492_v14  ;;  %753 = vmatmul.mubr.f32.vlgmr.msra.gmra.mrb[2].mxu0 %v25_v20  ;;  %v2512_v14 = vpack.c.bf16 %v239_v7, %v238_v6  ;;  %v2482_v20 = vpack.c.bf16 %v191_v12, %v190_v11  ;;  %v277_v51 = vld [vmem:[%s4451_s1 + $0x708] sm:$0xff]  ;;  %v263_v53 = vld [vmem:[%s4451_s1 + $0x698] sm:$0xff]  ;;  %v29_v56 = vld [vmem:[%s4450_s0 + $0x40] sm:$0xff] }
  0x45   :  { %2463 = vmatpush3.bf16.msra.mxu0 %v2462_v21  ;;  %892 = vmatprep.mubr.f32.mxu0 %v30_v34  ;;  %v2514_v21 = vpack.c.bf16 %v223_v15, %v222_v13  ;;  %v295_v55 = vld [vmem:[%s4451_s1 + $0x798] sm:$0xff]  ;;  %v31_v58 = vld [vmem:[%s4450_s0 + $0x50] sm:$0xff]  ;;  %v265_v3 = vld [vmem:[%s4451_s1 + $0x6a8] sm:$0xff] }
  0x46   :  { %823 = vmatmul.mubr.f32.vlgmr.msra.gmra.mrb[2].mxu1 %v27_v22  ;;  %2465 = vmatprep.subr.bf16.mxu0 %v2464_v24  ;;  %v2484_v22 = vpack.c.bf16 %v209_v17, %v208_v16  ;;  %v193_v24 = vld [vmem:[%s4451_s1 + $0x468] sm:$0xff]  ;;  %v278_v63 = vld [vmem:[%s4451_s1 + $0x710] sm:$0xff]  ;;  %v279_v1 = vld [vmem:[%s4451_s1 + $0x718] sm:$0xff] }
  0x47   :  { %2495 = vmatpush3.bf16.msra.mxu1 %v2494_v23  ;;  %962 = vmatprep.mubr.f32.mxu1 %v32_v36  ;;  %v192_v23 = vld [vmem:[%s4451_s1 + $0x460] sm:$0xff]  ;;  %v195_v36 = vld [vmem:[%s4451_s1 + $0x478] sm:$0xff]  ;;  %v297_v5 = vld [vmem:[%s4451_s1 + $0x7a8] sm:$0xff] }
  0x48   :  { %2497 = vmatprep.subr.bf16.mxu1 %v2496_v28  ;;  %v210_v28 = vld [vmem:[%s4451_s1 + $0x4f0] sm:$0xff]  ;;  %v2486_v32 = vpack.c.bf16 %v193_v24, %v192_v23  ;;  %v296_v4 = vld [vmem:[%s4451_s1 + $0x7a0] sm:$0xff]  ;;  %v34_v6 = vld [vmem:[%s4450_s0 + $0x68] sm:$0xff] }
  0x49   :  { %2467 = vmatpush3.bf16.msra.mxu0 %v2466_v35  ;;  %v2488_v34 = vpack.c.bf16 %v211_v29, %v210_v28  ;;  %v194_v35 = vld [vmem:[%s4451_s1 + $0x470] sm:$0xff]  ;;  %v248_v11 = vld [vmem:[%s4451_s1 + $0x620] sm:$0xff]  ;;  %v249_v12 = vld [vmem:[%s4451_s1 + $0x628] sm:$0xff] }
  0x4a   :  { %2469 = vmatprep.subr.bf16.mxu0 %v2468_v38  ;;  %v2520_v38 = vpack.c.bf16 %v243_v31, %v242_v30  ;;  %v2490_v44 = vpack.c.bf16 %v195_v36, %v194_v35  ;;  %v280_v13 = vld [vmem:[%s4451_s1 + $0x720] sm:$0xff]  ;;  %v281_v15 = vld [vmem:[%s4451_s1 + $0x728] sm:$0xff]  ;;  %v266_v16 = vld [vmem:[%s4451_s1 + $0x6b0] sm:$0xff] }
  0x4b   :  { %2499 = vmatpush3.bf16.msra.mxu1 %v2498_v37  ;;  %v226_v37 = vld [vmem:[%s4451_s1 + $0x570] sm:$0xff]  ;;  %v267_v17 = vld [vmem:[%s4451_s1 + $0x6b8] sm:$0xff]  ;;  %v268_v28 = vld [vmem:[%s4451_s1 + $0x6c0] sm:$0xff] }
  0x4c   :  { %2501 = vmatprep.subr.bf16.mxu1 %v2500_v42  ;;  %v292_v42 = vld [vmem:[%s4451_s1 + $0x780] sm:$0xff]  ;;  %v2522_v45 = vpack.c.bf16 %v227_v39, %v226_v37  ;;  %v298_v18 = vld [vmem:[%s4451_s1 + $0x7b0] sm:$0xff]  ;;  %v299_v19 = vld [vmem:[%s4451_s1 + $0x7b8] sm:$0xff] }
  0x4d   :  { %2471 = vmatpush3.bf16.msra.mxu0 %v2470_v48  ;;  %v245_v48 = vld [vmem:[%s4451_s1 + $0x608] sm:$0xff]  ;;  %v250_v23 = vld [vmem:[%s4451_s1 + $0x630] sm:$0xff]  ;;  %v251_v24 = vld [vmem:[%s4451_s1 + $0x638] sm:$0xff] }
  0x4e   :  { %2473 = vmatprep.subr.bf16.mxu0 %v2472_v50  ;;  %v2556_v50 = vpack.c.bf16 %v293_v43, %v292_v42  ;;  %v2526_v57 = vpack.c.bf16 %v245_v48, %v244_v47  ;;  %v282_v25 = vld [vmem:[%s4451_s1 + $0x730] sm:$0xff]  ;;  %v283_v27 = vld [vmem:[%s4451_s1 + $0x738] sm:$0xff]  ;;  %v269_v29 = vld [vmem:[%s4451_s1 + $0x6c8] sm:$0xff] }
  0x4f   :  { %2503 = vmatpush3.bf16.msra.mxu1 %v2502_v49  ;;  %v276_v49 = vld [vmem:[%s4451_s1 + $0x700] sm:$0xff]  ;;  %v301_v31 = vld [vmem:[%s4451_s1 + $0x7c8] sm:$0xff]  ;;  %v270_v40 = vld [vmem:[%s4451_s1 + $0x6d0] sm:$0xff] }
  0x50   :  { %2505 = vmatprep.subr.bf16.mxu1 %v2504_v54  ;;  %v294_v54 = vld [vmem:[%s4451_s1 + $0x790] sm:$0xff]  ;;  %v2558_v59 = vpack.c.bf16 %v277_v51, %v276_v49  ;;  %v300_v30 = vld [vmem:[%s4451_s1 + $0x7c0] sm:$0xff]  ;;  %v253_v36 = vld [vmem:[%s4451_s1 + $0x648] sm:$0xff] }
  0x51   :  { %2475 = vmatpush3.bf16.msra.mxu0 %v2474_v60  ;;  %v2528_v60 = vpack.c.bf16 %v263_v53, %v262_v52  ;;  %v2560_v0 = vpack.c.bf16 %v295_v55, %v294_v54  ;;  %v252_v35 = vld [vmem:[%s4451_s1 + $0x640] sm:$0xff]  ;;  %v285_v39 = vld [vmem:[%s4451_s1 + $0x748] sm:$0xff]  ;;  %v271_v41 = vld [vmem:[%s4451_s1 + $0x6d8] sm:$0xff] }
  0x52   :  { %2477 = vmatprep.subr.bf16.mxu0 %v2476_v62  ;;  %v247_v62 = vld [vmem:[%s4451_s1 + $0x618] sm:$0xff]  ;;  %v284_v37 = vld [vmem:[%s4451_s1 + $0x740] sm:$0xff]  ;;  %v302_v42 = vld [vmem:[%s4451_s1 + $0x7d0] sm:$0xff] }
  0x53   :  { %2507 = vmatpush3.bf16.msra.mxu1 %v2506_v61  ;;  %v246_v61 = vld [vmem:[%s4451_s1 + $0x610] sm:$0xff]  ;;  %v303_v43 = vld [vmem:[%s4451_s1 + $0x7d8] sm:$0xff]  ;;  %v272_v52 = vld [vmem:[%s4451_s1 + $0x6e0] sm:$0xff] }
  0x54   :  { %2509 = vmatprep.subr.bf16.mxu1 %v2508_v2  ;;  %v264_v2 = vld [vmem:[%s4451_s1 + $0x6a0] sm:$0xff]  ;;  %v2530_v7 = vpack.c.bf16 %v247_v62, %v246_v61  ;;  %v254_v47 = vld [vmem:[%s4451_s1 + $0x650] sm:$0xff]  ;;  %v255_v48 = vld [vmem:[%s4451_s1 + $0x658] sm:$0xff] }
  0x55   :  { %2479 = vmatpush3.bf16.msra.mxu0 %v2478_v8  ;;  %v36_v8 = vld [vmem:[%s4450_s0 + $0x78] sm:$0xff]  ;;  %v286_v49 = vld [vmem:[%s4451_s1 + $0x750] sm:$0xff]  ;;  %v273_v53 = vld [vmem:[%s4451_s1 + $0x6e8] sm:$0xff] }
  0x56   :  { %2481 = vmatprep.subr.bf16.mxu0 %v2480_v10  ;;  %v2532_v10 = vpack.c.bf16 %v265_v3, %v264_v2  ;;  %v287_v51 = vld [vmem:[%s4451_s1 + $0x758] sm:$0xff]  ;;  %v304_v54 = vld [vmem:[%s4451_s1 + $0x7e0] sm:$0xff]  ;;  %v305_v55 = vld [vmem:[%s4451_s1 + $0x7e8] sm:$0xff] }
  0x57   :  { %2511 = vmatpush3.bf16.msra.mxu1 %v2510_v9  ;;  %v2562_v9 = vpack.c.bf16 %v279_v1, %v278_v63  ;;  %v288_v61 = vld [vmem:[%s4451_s1 + $0x760] sm:$0xff]  ;;  %v2580_v62 = vpack.c.bf16 %v305_v55, %v304_v54  ;;  %v289_v63 = vld [vmem:[%s4451_s1 + $0x768] sm:$0xff]  ;;  %v275_v1 = vld [vmem:[%s4451_s1 + $0x6f8] sm:$0xff] }
  0x58   :  { %2513 = vmatprep.subr.bf16.mxu1 %v2512_v14  ;;  %v2564_v14 = vpack.c.bf16 %v297_v5, %v296_v4  ;;  %v306_v2 = vld [vmem:[%s4451_s1 + $0x7f0] sm:$0xff]  ;;  %v307_v3 = vld [vmem:[%s4451_s1 + $0x7f8] sm:$0xff]  ;;  %v2582_v5 = vpack.c.bf16 %v289_v63, %v288_v61 }
  0x59   :  { %2483 = vmatpush3.bf16.msra.mxu0 %v2482_v20  ;;  %v2534_v20 = vpack.c.bf16 %v249_v12, %v248_v11  ;;  %v291_v11 = vld [vmem:[%s4451_s1 + $0x778] sm:$0xff]  ;;  %v324_v12 = vld [vmem:[%s4451_s1 + $0x880] sm:$0xff]  ;;  %v362_v54 = vld [vmem:[%s4451_s1 + $0x9b0] sm:$0xff] }
  0x5a   :  { %2485 = vmatprep.subr.bf16.mxu0 %v2484_v22  ;;  %v2536_v22 = vpack.c.bf16 %v267_v17, %v266_v16  ;;  %v363_v55 = vld [vmem:[%s4451_s1 + $0x9b8] sm:$0xff]  ;;  %v346_v61 = vld [vmem:[%s4451_s1 + $0x930] sm:$0xff] }
  0x5b   :  { %2515 = vmatpush3.bf16.msra.mxu1 %v2514_v21  ;;  %v2566_v21 = vpack.c.bf16 %v281_v15, %v280_v13  ;;  %v325_v13 = vld [vmem:[%s4451_s1 + $0x888] sm:$0xff]  ;;  %v347_v63 = vld [vmem:[%s4451_s1 + $0x938] sm:$0xff] }
  0x5c   :  { %2517 = vmatprep.subr.bf16.mxu1 %v2516_v26  ;;  %v2568_v26 = vpack.c.bf16 %v299_v19, %v298_v18  ;;  %v357_v15 = vld [vmem:[%s4451_s1 + $0x988] sm:$0xff]  ;;  %v2588_v18 = vpack.c.bf16 %v325_v13, %v324_v12  ;;  %v308_v19 = vld [vmem:[%s4451_s1 + $0x800] sm:$0xff]  ;;  %v334_v12 = vld [vmem:[%s4451_s1 + $0x8d0] sm:$0xff] }
  0x5d   :  { %2487 = vmatpush3.bf16.msra.mxu0 %v2486_v32  ;;  %v2538_v32 = vpack.c.bf16 %v251_v24, %v250_v23  ;;  %v341_v23 = vld [vmem:[%s4451_s1 + $0x908] sm:$0xff]  ;;  %v326_v24 = vld [vmem:[%s4451_s1 + $0x890] sm:$0xff]  ;;  %v335_v13 = vld [vmem:[%s4451_s1 + $0x8d8] sm:$0xff] }
  0x5e   :  { %2489 = vmatprep.subr.bf16.mxu0 %v2488_v34  ;;  %v2540_v34 = vpack.c.bf16 %v269_v29, %v268_v28  ;;  %v33_v28 = vld [vmem:[%s4450_s0 + $0x60] sm:$0xff] }
  0x5f   :  { %2519 = vmatpush3.bf16.msra.mxu1 %v2518_v33  ;;  %v2570_v33 = vpack.c.bf16 %v283_v27, %v282_v25  ;;  %v327_v25 = vld [vmem:[%s4451_s1 + $0x898] sm:$0xff] }
  0x60   :  { %2521 = vmatprep.subr.bf16.mxu1 %v2520_v38  ;;  %v2572_v38 = vpack.c.bf16 %v301_v31, %v300_v30  ;;  %v359_v27 = vld [vmem:[%s4451_s1 + $0x998] sm:$0xff]  ;;  %v35_v30 = vld [vmem:[%s4450_s0 + $0x70] sm:$0xff] }
  0x61   :  { %2491 = vmatpush3.bf16.msra.mxu0 %v2490_v44  ;;  %v2542_v44 = vpack.c.bf16 %v253_v36, %v252_v35  ;;  %v342_v35 = vld [vmem:[%s4451_s1 + $0x910] sm:$0xff] }
  0x62   :  { %2525 = vmatprep.subr.bf16.mxu0 %v2524_v46  ;;  %v2544_v46 = vpack.c.bf16 %v271_v41, %v270_v40  ;;  %v360_v40 = vld [vmem:[%s4451_s1 + $0x9a0] sm:$0xff]  ;;  %v361_v41 = vld [vmem:[%s4451_s1 + $0x9a8] sm:$0xff] }
  0x63   :  { %2523 = vmatpush3.bf16.msra.mxu1 %v2522_v45  ;;  %v2574_v45 = vpack.c.bf16 %v285_v39, %v284_v37  ;;  %v343_v37 = vld [vmem:[%s4451_s1 + $0x918] sm:$0xff]  ;;  %v329_v39 = vld [vmem:[%s4451_s1 + $0x8a8] sm:$0xff] }
  0x64   :  { %2557 = vmatprep.subr.bf16.mxu1 %v2556_v50  ;;  %893 = vmatmul.mubr.f32.vlgmr.msra.gmra.mrb[4].mxu0 %v29_v56  ;;  %v2576_v50 = vpack.c.bf16 %v303_v43, %v302_v42  ;;  %v2546_v56 = vpack.c.bf16 %v255_v48, %v254_v47  ;;  %v38_v42 = vld [vmem:[%s4450_s0 + $0x88] sm:$0xff]  ;;  %v312_v47 = vld [vmem:[%s4451_s1 + $0x820] sm:$0xff] }
  0x65   :  { %2527 = vmatpush3.bf16.msra.mxu0 %v2526_v57  ;;  %1032 = vmatprep.mubr.f32.mxu0 %v34_v6  ;;  %v2578_v57 = vpack.c.bf16 %v287_v51, %v286_v49  ;;  %v313_v48 = vld [vmem:[%s4451_s1 + $0x828] sm:$0xff]  ;;  %v344_v49 = vld [vmem:[%s4451_s1 + $0x920] sm:$0xff] }
  0x66   :  { %963 = vmatmul.mubr.f32.vlgmr.msra.gmra.mrb[4].mxu1 %v31_v58  ;;  %2529 = vmatprep.subr.bf16.mxu0 %v2528_v60  ;;  %v2548_v58 = vpack.c.bf16 %v273_v53, %v272_v52  ;;  %v257_v60 = vld [vmem:[%s4451_s1 + $0x668] sm:$0xff]  ;;  %v330_v52 = vld [vmem:[%s4451_s1 + $0x8b0] sm:$0xff]  ;;  %v331_v53 = vld [vmem:[%s4451_s1 + $0x8b8] sm:$0xff] }
  0x67   :  { %2559 = vmatpush3.bf16.msra.mxu1 %v2558_v59  ;;  %1102 = vmatprep.mubr.f32.mxu1 %v36_v8  ;;  %v256_v59 = vld [vmem:[%s4451_s1 + $0x660] sm:$0xff]  ;;  %v259_v8 = vld [vmem:[%s4451_s1 + $0x678] sm:$0xff]  ;;  %v345_v51 = vld [vmem:[%s4451_s1 + $0x928] sm:$0xff] }
  0x68   :  { %2561 = vmatprep.subr.bf16.mxu1 %v2560_v0  ;;  %v274_v0 = vld [vmem:[%s4451_s1 + $0x6f0] sm:$0xff]  ;;  %v2550_v4 = vpack.c.bf16 %v257_v60, %v256_v59  ;;  %v315_v60 = vld [vmem:[%s4451_s1 + $0x838] sm:$0xff] }
  0x69   :  { %2531 = vmatpush3.bf16.msra.mxu0 %v2530_v7  ;;  %v2552_v6 = vpack.c.bf16 %v275_v1, %v274_v0  ;;  %v258_v7 = vld [vmem:[%s4451_s1 + $0x670] sm:$0xff]  ;;  %v332_v0 = vld [vmem:[%s4451_s1 + $0x8c0] sm:$0xff]  ;;  %v333_v1 = vld [vmem:[%s4451_s1 + $0x8c8] sm:$0xff] }
  0x6a   :  { %2533 = vmatprep.subr.bf16.mxu0 %v2532_v10  ;;  %v2584_v10 = vpack.c.bf16 %v307_v3, %v306_v2  ;;  %v2554_v16 = vpack.c.bf16 %v259_v8, %v258_v7  ;;  %v314_v59 = vld [vmem:[%s4451_s1 + $0x830] sm:$0xff]  ;;  %v364_v2 = vld [vmem:[%s4451_s1 + $0x9c0] sm:$0xff]  ;;  %v365_v3 = vld [vmem:[%s4451_s1 + $0x9c8] sm:$0xff] }
  0x6b   :  { %2563 = vmatpush3.bf16.msra.mxu1 %v2562_v9  ;;  %v290_v9 = vld [vmem:[%s4451_s1 + $0x770] sm:$0xff]  ;;  %v316_v7 = vld [vmem:[%s4451_s1 + $0x840] sm:$0xff]  ;;  %v317_v8 = vld [vmem:[%s4451_s1 + $0x848] sm:$0xff] }
  0x6c   :  { %2565 = vmatprep.subr.bf16.mxu1 %v2564_v14  ;;  %v356_v14 = vld [vmem:[%s4451_s1 + $0x980] sm:$0xff]  ;;  %v2586_v17 = vpack.c.bf16 %v291_v11, %v290_v9  ;;  %v349_v11 = vld [vmem:[%s4451_s1 + $0x948] sm:$0xff] }
  0x6d   :  { %2535 = vmatpush3.bf16.msra.mxu0 %v2534_v20  ;;  %v309_v20 = vld [vmem:[%s4451_s1 + $0x808] sm:$0xff]  ;;  %v348_v9 = vld [vmem:[%s4451_s1 + $0x940] sm:$0xff] }
  0x6e   :  { %2537 = vmatprep.subr.bf16.mxu0 %v2536_v22  ;;  %v2620_v22 = vpack.c.bf16 %v357_v15, %v356_v14  ;;  %v2590_v29 = vpack.c.bf16 %v309_v20, %v308_v19  ;;  %v366_v14 = vld [vmem:[%s4451_s1 + $0x9d0] sm:$0xff]  ;;  %v367_v15 = vld [vmem:[%s4451_s1 + $0x9d8] sm:$0xff] }
  0x6f   :  { %2567 = vmatpush3.bf16.msra.mxu1 %v2566_v21  ;;  %v340_v21 = vld [vmem:[%s4451_s1 + $0x900] sm:$0xff]  ;;  %v318_v19 = vld [vmem:[%s4451_s1 + $0x850] sm:$0xff]  ;;  %v319_v20 = vld [vmem:[%s4451_s1 + $0x858] sm:$0xff] }
  0x70   :  { %2569 = vmatprep.subr.bf16.mxu1 %v2568_v26  ;;  %v358_v26 = vld [vmem:[%s4451_s1 + $0x990] sm:$0xff]  ;;  %v2622_v31 = vpack.c.bf16 %v341_v23, %v340_v21  ;;  %v351_v23 = vld [vmem:[%s4451_s1 + $0x958] sm:$0xff] }
  0x71   :  { %2539 = vmatpush3.bf16.msra.mxu0 %v2538_v32  ;;  %v2592_v32 = vpack.c.bf16 %v327_v25, %v326_v24  ;;  %v2624_v36 = vpack.c.bf16 %v359_v27, %v358_v26  ;;  %v350_v21 = vld [vmem:[%s4451_s1 + $0x950] sm:$0xff]  ;;  %v336_v24 = vld [vmem:[%s4451_s1 + $0x8e0] sm:$0xff]  ;;  %v337_v25 = vld [vmem:[%s4451_s1 + $0x8e8] sm:$0xff] }
  0x72   :  { %2541 = vmatprep.subr.bf16.mxu0 %v2540_v34  ;;  %v311_v34 = vld [vmem:[%s4451_s1 + $0x818] sm:$0xff]  ;;  %v368_v26 = vld [vmem:[%s4451_s1 + $0x9e0] sm:$0xff]  ;;  %v369_v27 = vld [vmem:[%s4451_s1 + $0x9e8] sm:$0xff] }
  0x73   :  { %2571 = vmatpush3.bf16.msra.mxu1 %v2570_v33  ;;  %v310_v33 = vld [vmem:[%s4451_s1 + $0x810] sm:$0xff] }
  0x74   :  { %2573 = vmatprep.subr.bf16.mxu1 %v2572_v38  ;;  %v328_v38 = vld [vmem:[%s4451_s1 + $0x8a0] sm:$0xff]  ;;  %v2594_v43 = vpack.c.bf16 %v311_v34, %v310_v33  ;;  %v2644_v34 = vpack.c.bf16 %v369_v27, %v368_v26  ;;  %v426_v26 = vld [vmem:[%s4451_s1 + $0xbb0] sm:$0xff]  ;;  %v427_v27 = vld [vmem:[%s4451_s1 + $0xbb8] sm:$0xff] }
  0x75   :  { %2543 = vmatpush3.bf16.msra.mxu0 %v2542_v44  ;;  %v40_v44 = vld [vmem:[%s4450_s0 + $0x98] sm:$0xff]  ;;  %v352_v33 = vld [vmem:[%s4451_s1 + $0x960] sm:$0xff] }
  0x76   :  { %2545 = vmatprep.subr.bf16.mxu0 %v2544_v46  ;;  %v2596_v46 = vpack.c.bf16 %v329_v39, %v328_v38  ;;  %v370_v38 = vld [vmem:[%s4451_s1 + $0x9f0] sm:$0xff]  ;;  %v371_v39 = vld [vmem:[%s4451_s1 + $0x9f8] sm:$0xff] }
  0x77   :  { %2575 = vmatpush3.bf16.msra.mxu1 %v2574_v45  ;;  %v2626_v45 = vpack.c.bf16 %v343_v37, %v342_v35  ;;  %v353_v35 = vld [vmem:[%s4451_s1 + $0x968] sm:$0xff]  ;;  %v339_v37 = vld [vmem:[%s4451_s1 + $0x8f8] sm:$0xff] }
  0x78   :  { %2577 = vmatprep.subr.bf16.mxu1 %v2576_v50  ;;  %v2628_v50 = vpack.c.bf16 %v361_v41, %v360_v40  ;;  %v2646_v41 = vpack.c.bf16 %v353_v35, %v352_v33  ;;  %v410_v33 = vld [vmem:[%s4451_s1 + $0xb30] sm:$0xff]  ;;  %v411_v35 = vld [vmem:[%s4451_s1 + $0xb38] sm:$0xff] }
  0x79   :  { %2547 = vmatpush3.bf16.msra.mxu0 %v2546_v56  ;;  %v2598_v56 = vpack.c.bf16 %v313_v48, %v312_v47  ;;  %v355_v47 = vld [vmem:[%s4451_s1 + $0x978] sm:$0xff]  ;;  %v388_v48 = vld [vmem:[%s4451_s1 + $0xa80] sm:$0xff] }
  0x7a   :  { %2549 = vmatprep.subr.bf16.mxu0 %v2548_v58  ;;  %v2600_v58 = vpack.c.bf16 %v331_v53, %v330_v52 }
  0x7b   :  { %2579 = vmatpush3.bf16.msra.mxu1 %v2578_v57  ;;  %v2630_v57 = vpack.c.bf16 %v345_v51, %v344_v49  ;;  %v389_v49 = vld [vmem:[%s4451_s1 + $0xa88] sm:$0xff] }
  0x7c   :  { %2581 = vmatprep.subr.bf16.mxu1 %v2580_v62  ;;  %v2632_v62 = vpack.c.bf16 %v363_v55, %v362_v54  ;;  %v421_v51 = vld [vmem:[%s4451_s1 + $0xb88] sm:$0xff]  ;;  %v2652_v54 = vpack.c.bf16 %v389_v49, %v388_v48  ;;  %v372_v55 = vld [vmem:[%s4451_s1 + $0xa00] sm:$0xff] }
  0x7d   :  { %2551 = vmatpush3.bf16.msra.mxu0 %v2550_v4  ;;  %v2602_v4 = vpack.c.bf16 %v315_v60, %v314_v59  ;;  %v405_v59 = vld [vmem:[%s4451_s1 + $0xb08] sm:$0xff]  ;;  %v390_v60 = vld [vmem:[%s4451_s1 + $0xa90] sm:$0xff] }
  0x7e   :  { %2553 = vmatprep.subr.bf16.mxu0 %v2552_v6  ;;  %v2604_v6 = vpack.c.bf16 %v333_v1, %v332_v0  ;;  %v37_v0 = vld [vmem:[%s4450_s0 + $0x80] sm:$0xff] }
  0x7f   :  { %2583 = vmatpush3.bf16.msra.mxu1 %v2582_v5  ;;  %v2634_v5 = vpack.c.bf16 %v347_v63, %v346_v61  ;;  %v391_v61 = vld [vmem:[%s4451_s1 + $0xa98] sm:$0xff] }
  0x80   :  { %2585 = vmatprep.subr.bf16.mxu1 %v2584_v10  ;;  %v2636_v10 = vpack.c.bf16 %v365_v3, %v364_v2  ;;  %v423_v63 = vld [vmem:[%s4451_s1 + $0xb98] sm:$0xff]  ;;  %v39_v2 = vld [vmem:[%s4450_s0 + $0x90] sm:$0xff] }
  0x81   :  { %2555 = vmatpush3.bf16.msra.mxu0 %v2554_v16  ;;  %v2606_v16 = vpack.c.bf16 %v317_v8, %v316_v7  ;;  %v406_v7 = vld [vmem:[%s4451_s1 + $0xb10] sm:$0xff] }
  0x82   :  { %2589 = vmatprep.subr.bf16.mxu0 %v2588_v18  ;;  %v2608_v18 = vpack.c.bf16 %v335_v13, %v334_v12  ;;  %v424_v12 = vld [vmem:[%s4451_s1 + $0xba0] sm:$0xff]  ;;  %v425_v13 = vld [vmem:[%s4451_s1 + $0xba8] sm:$0xff] }
  0x83   :  { %2587 = vmatpush3.bf16.msra.mxu1 %v2586_v17  ;;  %v2638_v17 = vpack.c.bf16 %v349_v11, %v348_v9  ;;  %v407_v9 = vld [vmem:[%s4451_s1 + $0xb18] sm:$0xff]  ;;  %v393_v11 = vld [vmem:[%s4451_s1 + $0xaa8] sm:$0xff] }
  0x84   :  { %2621 = vmatprep.subr.bf16.mxu1 %v2620_v22  ;;  %1033 = vmatmul.mubr.f32.vlgmr.msra.gmra.mrb[6].mxu0 %v33_v28  ;;  %v2640_v22 = vpack.c.bf16 %v367_v15, %v366_v14  ;;  %v2610_v28 = vpack.c.bf16 %v319_v20, %v318_v19  ;;  %v42_v14 = vld [vmem:[%s4450_s0 + $0xa8] sm:$0xff]  ;;  %v376_v19 = vld [vmem:[%s4451_s1 + $0xa20] sm:$0xff] }
  0x85   :  { %2591 = vmatpush3.bf16.msra.mxu0 %v2590_v29  ;;  %1172 = vmatprep.mubr.f32.mxu0 %v38_v42  ;;  %v2642_v29 = vpack.c.bf16 %v351_v23, %v350_v21  ;;  %v377_v20 = vld [vmem:[%s4451_s1 + $0xa28] sm:$0xff]  ;;  %v408_v21 = vld [vmem:[%s4451_s1 + $0xb20] sm:$0xff] }
  0x86   :  { %1103 = vmatmul.mubr.f32.vlgmr.msra.gmra.mrb[6].mxu1 %v35_v30  ;;  %2593 = vmatprep.subr.bf16.mxu0 %v2592_v32  ;;  %v2612_v30 = vpack.c.bf16 %v337_v25, %v336_v24  ;;  %v321_v32 = vld [vmem:[%s4451_s1 + $0x868] sm:$0xff]  ;;  %v394_v24 = vld [vmem:[%s4451_s1 + $0xab0] sm:$0xff]  ;;  %v395_v25 = vld [vmem:[%s4451_s1 + $0xab8] sm:$0xff] }
  0x87   :  { %2623 = vmatpush3.bf16.msra.mxu1 %v2622_v31  ;;  %1242 = vmatprep.mubr.f32.mxu1 %v40_v44  ;;  %v320_v31 = vld [vmem:[%s4451_s1 + $0x860] sm:$0xff]  ;;  %v323_v44 = vld [vmem:[%s4451_s1 + $0x878] sm:$0xff]  ;;  %v409_v23 = vld [vmem:[%s4451_s1 + $0xb28] sm:$0xff] }
  0x88   :  { %2625 = vmatprep.subr.bf16.mxu1 %v2624_v36  ;;  %v338_v36 = vld [vmem:[%s4451_s1 + $0x8f0] sm:$0xff]  ;;  %v2614_v40 = vpack.c.bf16 %v321_v32, %v320_v31  ;;  %v379_v32 = vld [vmem:[%s4451_s1 + $0xa38] sm:$0xff] }
  0x89   :  { %2595 = vmatpush3.bf16.msra.mxu0 %v2594_v43  ;;  %v2616_v42 = vpack.c.bf16 %v339_v37, %v338_v36  ;;  %v322_v43 = vld [vmem:[%s4451_s1 + $0x870] sm:$0xff]  ;;  %v396_v36 = vld [vmem:[%s4451_s1 + $0xac0] sm:$0xff]  ;;  %v397_v37 = vld [vmem:[%s4451_s1 + $0xac8] sm:$0xff] }
  0x8a   :  { %2597 = vmatprep.subr.bf16.mxu0 %v2596_v46  ;;  %v2648_v46 = vpack.c.bf16 %v371_v39, %v370_v38  ;;  %v2618_v52 = vpack.c.bf16 %v323_v44, %v322_v43  ;;  %v378_v31 = vld [vmem:[%s4451_s1 + $0xa30] sm:$0xff]  ;;  %v428_v38 = vld [vmem:[%s4451_s1 + $0xbc0] sm:$0xff]  ;;  %v429_v39 = vld [vmem:[%s4451_s1 + $0xbc8] sm:$0xff] }
  0x8b   :  { %2627 = vmatpush3.bf16.msra.mxu1 %v2626_v45  ;;  %v354_v45 = vld [vmem:[%s4451_s1 + $0x970] sm:$0xff] }
  0x8c   :  { %2629 = vmatprep.subr.bf16.mxu1 %v2628_v50  ;;  %v420_v50 = vld [vmem:[%s4451_s1 + $0xb80] sm:$0xff]  ;;  %v2650_v53 = vpack.c.bf16 %v355_v47, %v354_v45 }
  0x8d   :  { %2599 = vmatpush3.bf16.msra.mxu0 %v2598_v56  ;;  %v373_v56 = vld [vmem:[%s4451_s1 + $0xa08] sm:$0xff] }
  0x8e   :  { %2601 = vmatprep.subr.bf16.mxu0 %v2600_v58  ;;  %v2684_v58 = vpack.c.bf16 %v421_v51, %v420_v50  ;;  %v2654_v1 = vpack.c.bf16 %v373_v56, %v372_v55 }
  0x8f   :  { %2631 = vmatpush3.bf16.msra.mxu1 %v2630_v57  ;;  %v404_v57 = vld [vmem:[%s4451_s1 + $0xb00] sm:$0xff] }
  0x90   :  { %2633 = vmatprep.subr.bf16.mxu1 %v2632_v62  ;;  %v422_v62 = vld [vmem:[%s4451_s1 + $0xb90] sm:$0xff]  ;;  %v2686_v3 = vpack.c.bf16 %v405_v59, %v404_v57 }
  0x91   :  { %2603 = vmatpush3.bf16.msra.mxu0 %v2602_v4  ;;  %v2656_v4 = vpack.c.bf16 %v391_v61, %v390_v60  ;;  %v2688_v8 = vpack.c.bf16 %v423_v63, %v422_v62 }
  0x92   :  { %2605 = vmatprep.subr.bf16.mxu0 %v2604_v6  ;;  %v375_v6 = vld [vmem:[%s4451_s1 + $0xa18] sm:$0xff] }
  0x93   :  { %2635 = vmatpush3.bf16.msra.mxu1 %v2634_v5  ;;  %v374_v5 = vld [vmem:[%s4451_s1 + $0xa10] sm:$0xff] }
  0x94   :  { %2637 = vmatprep.subr.bf16.mxu1 %v2636_v10  ;;  %v392_v10 = vld [vmem:[%s4451_s1 + $0xaa0] sm:$0xff]  ;;  %v2658_v15 = vpack.c.bf16 %v375_v6, %v374_v5 }
  0x95   :  { %2607 = vmatpush3.bf16.msra.mxu0 %v2606_v16  ;;  %v44_v16 = vld [vmem:[%s4450_s0 + $0xb8] sm:$0xff] }
  0x96   :  { %2609 = vmatprep.subr.bf16.mxu0 %v2608_v18  ;;  %v2660_v18 = vpack.c.bf16 %v393_v11, %v392_v10 }
  0x97   :  { %2639 = vmatpush3.bf16.msra.mxu1 %v2638_v17  ;;  %v2690_v17 = vpack.c.bf16 %v407_v9, %v406_v7 }
  0x98   :  { %2641 = vmatprep.subr.bf16.mxu1 %v2640_v22  ;;  %v2692_v22 = vpack.c.bf16 %v425_v13, %v424_v12 }
  0x99   :  { %2611 = vmatpush3.bf16.msra.mxu0 %v2610_v28  ;;  %v2662_v28 = vpack.c.bf16 %v377_v20, %v376_v19 }
  0x9a   :  { %2613 = vmatprep.subr.bf16.mxu0 %v2612_v30  ;;  %v2664_v30 = vpack.c.bf16 %v395_v25, %v394_v24 }
  0x9b   :  { %2643 = vmatpush3.bf16.msra.mxu1 %v2642_v29  ;;  %v2694_v29 = vpack.c.bf16 %v409_v23, %v408_v21 }
  0x9c   :  { %2645 = vmatprep.subr.bf16.mxu1 %v2644_v34  ;;  %v2696_v34 = vpack.c.bf16 %v427_v27, %v426_v26 }
  0x9d   :  { %2615 = vmatpush3.bf16.msra.mxu0 %v2614_v40 }
  0x9e   :  { %2617 = vmatprep.subr.bf16.mxu0 %v2616_v42 }
  0x9f   :  { %2647 = vmatpush3.bf16.msra.mxu1 %v2646_v41 }
  0xa0   :  { %2649 = vmatprep.subr.bf16.mxu1 %v2648_v46 }
  0xa1   :  { %2619 = vmatpush3.bf16.msra.mxu0 %v2618_v52 }
  0xa2   :  { %2653 = vmatprep.subr.bf16.mxu0 %v2652_v54 }
  0xa3   :  { %2651 = vmatpush3.bf16.msra.mxu1 %v2650_v53 }
  0xa4   :  { %2685 = vmatprep.subr.bf16.mxu1 %v2684_v58  ;;  %1173 = vmatmul.mubr.f32.vlgmr.msra.gmra.mrb[8].mxu0 %v37_v0 }
  0xa5   :  { %2655 = vmatpush3.bf16.msra.mxu0 %v2654_v1  ;;  %1312 = vmatprep.mubr.f32.mxu0 %v42_v14 }
  0xa6   :  { %1243 = vmatmul.mubr.f32.vlgmr.msra.gmra.mrb[8].mxu1 %v39_v2  ;;  %2657 = vmatprep.subr.bf16.mxu0 %v2656_v4 }
  0xa7   :  { %2687 = vmatpush3.bf16.msra.mxu1 %v2686_v3  ;;  %1382 = vmatprep.mubr.f32.mxu1 %v44_v16 }
  0xa8   :  { %2689 = vmatprep.subr.bf16.mxu1 %v2688_v8 }
  0xa9   :  { %2659 = vmatpush3.bf16.msra.mxu0 %v2658_v15 }
  0xaa   :  { %2661 = vmatprep.subr.bf16.mxu0 %v2660_v18 }
  0xab   :  { %2691 = vmatpush3.bf16.msra.mxu1 %v2690_v17 }
  0xac   :  { %2693 = vmatprep.subr.bf16.mxu1 %v2692_v22 }
  0xad   :  { %10 = vsyncpa [#allocation3], 0  ;;  %2663 = vmatpush3.bf16.msra.mxu0 %v2662_v28  ;;  %v2666_v40 = vpack.c.bf16 %v379_v32, %v378_v31  ;;  %v2698_v41 = vpack.c.bf16 %v411_v35, %v410_v33  ;;  %v2668_v42 = vpack.c.bf16 %v397_v37, %v396_v36  ;;  %v380_v43 = vld [vmem:[%s4451_s1 + $0xa40] sm:$0xff]  ;;  %v381_v44 = vld [vmem:[%s4451_s1 + $0xa48] sm:$0xff]  ;;  %v2700_v46 = vpack.c.bf16 %v429_v39, %v428_v38  ;;  %s2853_s25 = smov [#allocation2]  }
  0xae   :  { %2665 = vmatprep.subr.bf16.mxu0 %v2664_v30  ;;  %v412_v45 = vld [vmem:[%s4451_s1 + $0xb40] sm:$0xff]  ;;  %v413_v47 = vld [vmem:[%s4451_s1 + $0xb48] sm:$0xff]  ;;  %v398_v48 = vld [vmem:[%s4451_s1 + $0xad0] sm:$0xff]  ;;  %v2670_v52 = vpack.c.bf16 %v381_v44, %v380_v43  ;;  %vm544_vm0 = vcmask 1043456   ;;  %vm540_vm1 = vcmask 31744   ;;  %vm2851_vm2 = vmmov 0  }
  0xaf   :  { %2695 = vmatpush3.bf16.msra.mxu1 %v2694_v29  ;;  %v399_v49 = vld [vmem:[%s4451_s1 + $0xad8] sm:$0xff]  ;;  %v430_v50 = vld [vmem:[%s4451_s1 + $0xbd0] sm:$0xff]  ;;  %v2702_v53 = vpack.c.bf16 %v413_v47, %v412_v45  ;;  %v400_v60 = vld [vmem:[%s4451_s1 + $0xae0] sm:$0xff]  ;;  %vm1680_vm3 = vcmask 261120   ;;  %s1771_s26 = sshll.u32 %s2853_s25, 4  ;;  %s1772_s26 = int_to_ptr.vmem [resolvable:$true] %s1771_s26 }
  0xb0   :  { %2697 = vmatprep.subr.bf16.mxu1 %v2696_v34  ;;  %v431_v51 = vld [vmem:[%s4451_s1 + $0xbd8] sm:$0xff]  ;;  %v2672_v54 = vpack.c.bf16 %v399_v49, %v398_v48  ;;  %v382_v55 = vld [vmem:[%s4451_s1 + $0xa50] sm:$0xff]  ;;  %v401_v61 = vld [vmem:[%s4451_s1 + $0xae8] sm:$0xff]  ;;  %p2831_p1 = scmp.lt.s32.totalorder %s1772_s26, %s1772_s26 }
  0xb1   :  { %2667 = vmatpush3.bf16.msra.mxu0 %v2666_v40  ;;  %v383_v56 = vld [vmem:[%s4451_s1 + $0xa58] sm:$0xff]  ;;  %v414_v57 = vld [vmem:[%s4451_s1 + $0xb50] sm:$0xff]  ;;  %v2704_v58 = vpack.c.bf16 %v431_v51, %v430_v50  ;;  %v432_v62 = vld [vmem:[%s4451_s1 + $0xbe0] sm:$0xff]  ;;  %v2676_v2 = vpack.c.bf16 %v401_v61, %v400_v60 }
  0xb2   :  { %2669 = vmatprep.subr.bf16.mxu0 %v2668_v42  ;;  %v415_v59 = vld [vmem:[%s4451_s1 + $0xb58] sm:$0xff]  ;;  %v433_v63 = vld [vmem:[%s4451_s1 + $0xbe8] sm:$0xff]  ;;  %v2674_v0 = vpack.c.bf16 %v383_v56, %v382_v55  ;;  %v384_v3 = vld [vmem:[%s4451_s1 + $0xa60] sm:$0xff] }
  0xb3   :  { %2699 = vmatpush3.bf16.msra.mxu1 %v2698_v41  ;;  %v2706_v1 = vpack.c.bf16 %v415_v59, %v414_v57  ;;  %v385_v4 = vld [vmem:[%s4451_s1 + $0xa68] sm:$0xff]  ;;  %v416_v5 = vld [vmem:[%s4451_s1 + $0xb60] sm:$0xff]  ;;  %v2708_v6 = vpack.c.bf16 %v433_v63, %v432_v62  ;;  %v402_v8 = vld [vmem:[%s4451_s1 + $0xaf0] sm:$0xff] }
  0xb4   :  { %2701 = vmatprep.subr.bf16.mxu1 %v2700_v46  ;;  %v417_v7 = vld [vmem:[%s4451_s1 + $0xb68] sm:$0xff]  ;;  %v403_v9 = vld [vmem:[%s4451_s1 + $0xaf8] sm:$0xff]  ;;  %v434_v10 = vld [vmem:[%s4451_s1 + $0xbf0] sm:$0xff]  ;;  %v2678_v12 = vpack.c.bf16 %v385_v4, %v384_v3 }
  0xb5   :  { %2671 = vmatpush3.bf16.msra.mxu0 %v2670_v52  ;;  %v435_v11 = vld [vmem:[%s4451_s1 + $0xbf8] sm:$0xff]  ;;  %v2710_v13 = vpack.c.bf16 %v417_v7, %v416_v5  ;;  %v2680_v14 = vpack.c.bf16 %v403_v9, %v402_v8  ;;  %v386_v15 = vld [vmem:[%s4451_s1 + $0xa70] sm:$0xff]  ;;  %v452_v20 = vld [vmem:[%s4451_s1 + $0xc80] sm:$0xff] }
  0xb6   :  { %2673 = vmatprep.subr.bf16.mxu0 %v2672_v54  ;;  %v387_v16 = vld [vmem:[%s4451_s1 + $0xa78] sm:$0xff]  ;;  %v418_v17 = vld [vmem:[%s4451_s1 + $0xb70] sm:$0xff]  ;;  %v2712_v18 = vpack.c.bf16 %v435_v11, %v434_v10  ;;  %v453_v21 = vld [vmem:[%s4451_s1 + $0xc88] sm:$0xff] }
  0xb7   :  { %2703 = vmatpush3.bf16.msra.mxu1 %v2702_v53  ;;  %v419_v19 = vld [vmem:[%s4451_s1 + $0xb78] sm:$0xff]  ;;  %v484_v22 = vld [vmem:[%s4451_s1 + $0xd80] sm:$0xff]  ;;  %v485_v23 = vld [vmem:[%s4451_s1 + $0xd88] sm:$0xff]  ;;  %v2682_v24 = vpack.c.bf16 %v387_v16, %v386_v15  ;;  %v2716_v26 = vpack.c.bf16 %v453_v21, %v452_v20 }
  0xb8   :  { %2705 = vmatprep.subr.bf16.mxu1 %v2704_v58  ;;  %v2714_v25 = vpack.c.bf16 %v419_v19, %v418_v17  ;;  %v436_v27 = vld [vmem:[%s4451_s1 + $0xc00] sm:$0xff]  ;;  %v437_v28 = vld [vmem:[%s4451_s1 + $0xc08] sm:$0xff]  ;;  %v2748_v30 = vpack.c.bf16 %v485_v23, %v484_v22  ;;  %v454_v32 = vld [vmem:[%s4451_s1 + $0xc90] sm:$0xff] }
  0xb9   :  { %2675 = vmatpush3.bf16.msra.mxu0 %v2674_v0  ;;  %v468_v29 = vld [vmem:[%s4451_s1 + $0xd00] sm:$0xff]  ;;  %v469_v31 = vld [vmem:[%s4451_s1 + $0xd08] sm:$0xff]  ;;  %v455_v33 = vld [vmem:[%s4451_s1 + $0xc98] sm:$0xff]  ;;  %v2718_v37 = vpack.c.bf16 %v437_v28, %v436_v27 }
  0xba   :  { %2677 = vmatprep.subr.bf16.mxu0 %v2676_v2  ;;  %v486_v34 = vld [vmem:[%s4451_s1 + $0xd90] sm:$0xff]  ;;  %v487_v35 = vld [vmem:[%s4451_s1 + $0xd98] sm:$0xff]  ;;  %v41_v36 = vld [vmem:[%s4450_s0 + $0xa0] sm:$0xff]  ;;  %v2750_v39 = vpack.c.bf16 %v469_v31, %v468_v29  ;;  %v2720_v40 = vpack.c.bf16 %v455_v33, %v454_v32 }
  0xbb   :  { %2707 = vmatpush3.bf16.msra.mxu1 %v2706_v1  ;;  %v43_v38 = vld [vmem:[%s4450_s0 + $0xb0] sm:$0xff]  ;;  %v439_v42 = vld [vmem:[%s4451_s1 + $0xc18] sm:$0xff]  ;;  %v2752_v44 = vpack.c.bf16 %v487_v35, %v486_v34  ;;  %v456_v46 = vld [vmem:[%s4451_s1 + $0xca0] sm:$0xff] }
  0xbc   :  { %2709 = vmatprep.subr.bf16.mxu1 %v2708_v6  ;;  %v438_v41 = vld [vmem:[%s4451_s1 + $0xc10] sm:$0xff]  ;;  %v471_v45 = vld [vmem:[%s4451_s1 + $0xd18] sm:$0xff]  ;;  %v457_v47 = vld [vmem:[%s4451_s1 + $0xca8] sm:$0xff] }
  0xbd   :  { %2679 = vmatpush3.bf16.msra.mxu0 %v2678_v12  ;;  %v470_v43 = vld [vmem:[%s4451_s1 + $0xd10] sm:$0xff]  ;;  %v488_v48 = vld [vmem:[%s4451_s1 + $0xda0] sm:$0xff]  ;;  %v489_v49 = vld [vmem:[%s4451_s1 + $0xda8] sm:$0xff]  ;;  %v2722_v51 = vpack.c.bf16 %v439_v42, %v438_v41  ;;  %v2724_v54 = vpack.c.bf16 %v457_v47, %v456_v46 }
  0xbe   :  { %2681 = vmatprep.subr.bf16.mxu0 %v2680_v14  ;;  %v46_v50 = vld [vmem:[%s4450_s0 + $0xc8] sm:$0xff]  ;;  %v48_v52 = vld [vmem:[%s4450_s0 + $0xd8] sm:$0xff]  ;;  %v2754_v53 = vpack.c.bf16 %v471_v45, %v470_v43  ;;  %v440_v55 = vld [vmem:[%s4451_s1 + $0xc20] sm:$0xff]  ;;  %v2756_v58 = vpack.c.bf16 %v489_v49, %v488_v48 }
  0xbf   :  { %2711 = vmatpush3.bf16.msra.mxu1 %v2710_v13  ;;  %v441_v56 = vld [vmem:[%s4451_s1 + $0xc28] sm:$0xff]  ;;  %v472_v57 = vld [vmem:[%s4451_s1 + $0xd20] sm:$0xff]  ;;  %v458_v60 = vld [vmem:[%s4451_s1 + $0xcb0] sm:$0xff] }
  0xc0   :  { %2713 = vmatprep.subr.bf16.mxu1 %v2712_v18  ;;  %v473_v59 = vld [vmem:[%s4451_s1 + $0xd28] sm:$0xff]  ;;  %v459_v61 = vld [vmem:[%s4451_s1 + $0xcb8] sm:$0xff]  ;;  %v490_v62 = vld [vmem:[%s4451_s1 + $0xdb0] sm:$0xff]  ;;  %v2726_v0 = vpack.c.bf16 %v441_v56, %v440_v55 }
  0xc1   :  { %2683 = vmatpush3.bf16.msra.mxu0 %v2682_v24  ;;  %v491_v63 = vld [vmem:[%s4451_s1 + $0xdb8] sm:$0xff]  ;;  %v2758_v1 = vpack.c.bf16 %v473_v59, %v472_v57  ;;  %v2728_v2 = vpack.c.bf16 %v459_v61, %v458_v60  ;;  %v442_v3 = vld [vmem:[%s4451_s1 + $0xc30] sm:$0xff]  ;;  %v460_v8 = vld [vmem:[%s4451_s1 + $0xcc0] sm:$0xff] }
  0xc2   :  { %2717 = vmatprep.subr.bf16.mxu0 %v2716_v26  ;;  %v443_v4 = vld [vmem:[%s4451_s1 + $0xc38] sm:$0xff]  ;;  %v474_v5 = vld [vmem:[%s4451_s1 + $0xd30] sm:$0xff]  ;;  %v2760_v6 = vpack.c.bf16 %v491_v63, %v490_v62  ;;  %v461_v9 = vld [vmem:[%s4451_s1 + $0xcc8] sm:$0xff] }
  0xc3   :  { %2715 = vmatpush3.bf16.msra.mxu1 %v2714_v25  ;;  %v475_v7 = vld [vmem:[%s4451_s1 + $0xd38] sm:$0xff]  ;;  %v492_v10 = vld [vmem:[%s4451_s1 + $0xdc0] sm:$0xff]  ;;  %v493_v11 = vld [vmem:[%s4451_s1 + $0xdc8] sm:$0xff]  ;;  %v2730_v12 = vpack.c.bf16 %v443_v4, %v442_v3  ;;  %v2732_v14 = vpack.c.bf16 %v461_v9, %v460_v8 }
  0xc4   :  { %2749 = vmatprep.subr.bf16.mxu1 %v2748_v30  ;;  %1313 = vmatmul.mubr.f32.vlgmr.msra.gmra.mrb[10].mxu0 %v41_v36  ;;  %v2762_v13 = vpack.c.bf16 %v475_v7, %v474_v5  ;;  %v444_v15 = vld [vmem:[%s4451_s1 + $0xc40] sm:$0xff]  ;;  %v445_v16 = vld [vmem:[%s4451_s1 + $0xc48] sm:$0xff]  ;;  %v2764_v18 = vpack.c.bf16 %v493_v11, %v492_v10  ;;  %v462_v20 = vld [vmem:[%s4451_s1 + $0xcd0] sm:$0xff]  ;;  %v2850_v10 = vmov 0.0  }
  0xc5   :  { %2719 = vmatpush3.bf16.msra.mxu0 %v2718_v37  ;;  %1452 = vmatprep.mubr.f32.mxu0 %v46_v50  ;;  %v476_v17 = vld [vmem:[%s4451_s1 + $0xd40] sm:$0xff]  ;;  %v477_v19 = vld [vmem:[%s4451_s1 + $0xd48] sm:$0xff]  ;;  %v463_v21 = vld [vmem:[%s4451_s1 + $0xcd8] sm:$0xff]  ;;  %v2734_v24 = vpack.c.bf16 %v445_v16, %v444_v15 }
  0xc6   :  { %1383 = vmatmul.mubr.f32.vlgmr.msra.gmra.mrb[10].mxu1 %v43_v38  ;;  %2721 = vmatprep.subr.bf16.mxu0 %v2720_v40  ;;  %v494_v22 = vld [vmem:[%s4451_s1 + $0xdd0] sm:$0xff]  ;;  %v495_v23 = vld [vmem:[%s4451_s1 + $0xdd8] sm:$0xff]  ;;  %v2766_v25 = vpack.c.bf16 %v477_v19, %v476_v17  ;;  %v2736_v26 = vpack.c.bf16 %v463_v21, %v462_v20  ;;  %v464_v32 = vld [vmem:[%s4451_s1 + $0xce0] sm:$0xff] }
  0xc7   :  { %2751 = vmatpush3.bf16.msra.mxu1 %v2750_v39  ;;  %1522 = vmatprep.mubr.f32.mxu1 %v48_v52  ;;  %v446_v27 = vld [vmem:[%s4451_s1 + $0xc50] sm:$0xff]  ;;  %v447_v28 = vld [vmem:[%s4451_s1 + $0xc58] sm:$0xff]  ;;  %v2768_v30 = vpack.c.bf16 %v495_v23, %v494_v22  ;;  %v465_v33 = vld [vmem:[%s4451_s1 + $0xce8] sm:$0xff] }
  0xc8   :  { %2753 = vmatprep.subr.bf16.mxu1 %v2752_v44  ;;  %v478_v29 = vld [vmem:[%s4451_s1 + $0xd50] sm:$0xff]  ;;  %v479_v31 = vld [vmem:[%s4451_s1 + $0xd58] sm:$0xff]  ;;  %v496_v34 = vld [vmem:[%s4451_s1 + $0xde0] sm:$0xff]  ;;  %v2738_v36 = vpack.c.bf16 %v447_v28, %v446_v27  ;;  %v2740_v38 = vpack.c.bf16 %v465_v33, %v464_v32 }
  0xc9   :  { %2723 = vmatpush3.bf16.msra.mxu0 %v2722_v51  ;;  %v497_v35 = vld [vmem:[%s4451_s1 + $0xde8] sm:$0xff]  ;;  %v2770_v37 = vpack.c.bf16 %v479_v31, %v478_v29  ;;  %v448_v39 = vld [vmem:[%s4451_s1 + $0xc60] sm:$0xff]  ;;  %v466_v44 = vld [vmem:[%s4451_s1 + $0xcf0] sm:$0xff] }
  0xca   :  { %2725 = vmatprep.subr.bf16.mxu0 %v2724_v54  ;;  %v449_v40 = vld [vmem:[%s4451_s1 + $0xc68] sm:$0xff]  ;;  %v480_v41 = vld [vmem:[%s4451_s1 + $0xd60] sm:$0xff]  ;;  %v2772_v42 = vpack.c.bf16 %v497_v35, %v496_v34  ;;  %v467_v45 = vld [vmem:[%s4451_s1 + $0xcf8] sm:$0xff] }
  0xcb   :  { %2755 = vmatpush3.bf16.msra.mxu1 %v2754_v53  ;;  %v481_v43 = vld [vmem:[%s4451_s1 + $0xd68] sm:$0xff]  ;;  %v498_v46 = vld [vmem:[%s4451_s1 + $0xdf0] sm:$0xff]  ;;  %v499_v47 = vld [vmem:[%s4451_s1 + $0xdf8] sm:$0xff]  ;;  %v2742_v48 = vpack.c.bf16 %v449_v40, %v448_v39  ;;  %v2744_v50 = vpack.c.bf16 %v467_v45, %v466_v44 }
  0xcc   :  { %2757 = vmatprep.subr.bf16.mxu1 %v2756_v58  ;;  %v2774_v49 = vpack.c.bf16 %v481_v43, %v480_v41  ;;  %v450_v51 = vld [vmem:[%s4451_s1 + $0xc70] sm:$0xff]  ;;  %v451_v52 = vld [vmem:[%s4451_s1 + $0xc78] sm:$0xff]  ;;  %v2776_v54 = vpack.c.bf16 %v499_v47, %v498_v46  ;;  %v516_v56 = vld [vmem:[%s4451_s1 + $0xe80] sm:$0xff] }
  0xcd   :  { %2727 = vmatpush3.bf16.msra.mxu0 %v2726_v0  ;;  %v482_v53 = vld [vmem:[%s4451_s1 + $0xd70] sm:$0xff]  ;;  %v483_v55 = vld [vmem:[%s4451_s1 + $0xd78] sm:$0xff]  ;;  %v517_v57 = vld [vmem:[%s4451_s1 + $0xe88] sm:$0xff]  ;;  %v2746_v58 = vpack.c.bf16 %v451_v52, %v450_v51 }
  0xce   :  { %2729 = vmatprep.subr.bf16.mxu0 %v2728_v2  ;;  %v2778_v59 = vpack.c.bf16 %v483_v55, %v482_v53  ;;  %v2780_v60 = vpack.c.bf16 %v517_v57, %v516_v56  ;;  %v500_v61 = vld [vmem:[%s4451_s1 + $0xe00] sm:$0xff]  ;;  %v501_v62 = vld [vmem:[%s4451_s1 + $0xe08] sm:$0xff]  ;;  %v518_v63 = vld [vmem:[%s4451_s1 + $0xe90] sm:$0xff] }
  0xcf   :  { %2759 = vmatpush3.bf16.msra.mxu1 %v2758_v1  ;;  %v519_v0 = vld [vmem:[%s4451_s1 + $0xe98] sm:$0xff]  ;;  %v45_v1 = vld [vmem:[%s4450_s0 + $0xc0] sm:$0xff]  ;;  %v2782_v2 = vpack.c.bf16 %v501_v62, %v500_v61  ;;  %v47_v3 = vld [vmem:[%s4450_s0 + $0xd0] sm:$0xff] }
  0xd0   :  { %2761 = vmatprep.subr.bf16.mxu1 %v2760_v6  ;;  %v2784_v4 = vpack.c.bf16 %v519_v0, %v518_v63  ;;  %v502_v5 = vld [vmem:[%s4451_s1 + $0xe10] sm:$0xff]  ;;  %v503_v6 = vld [vmem:[%s4451_s1 + $0xe18] sm:$0xff]  ;;  %v520_v7 = vld [vmem:[%s4451_s1 + $0xea0] sm:$0xff] }
  0xd1   :  { %2731 = vmatpush3.bf16.msra.mxu0 %v2730_v12  ;;  %v521_v8 = vld [vmem:[%s4451_s1 + $0xea8] sm:$0xff]  ;;  %v532_v11 = vld [vmem:[%s4451_s1 + $0xf00] sm:$0xf]  ;;  %v2786_v12 = vpack.c.bf16 %v503_v6, %v502_v5  ;;  %v51_v16 = vld [vmem:[%s4450_s0 + $0xf0] sm:$0xff] }
  0xd2   :  { %2733 = vmatprep.subr.bf16.mxu0 %v2732_v14  ;;  %v50_v9 = vld [vmem:[%s4450_s0 + $0xe8] sm:$0xff]  ;;  %v504_v14 = vld [vmem:[%s4451_s1 + $0xe20] sm:$0xff]  ;;  %v522_v17 = vld [vmem:[%s4451_s1 + $0xeb0] sm:$0xff] }
  0xd3   :  { %2763 = vmatpush3.bf16.msra.mxu1 %v2762_v13  ;;  %v2788_v13 = vpack.c.bf16 %v521_v8, %v520_v7  ;;  %v505_v15 = vld [vmem:[%s4451_s1 + $0xe28] sm:$0xff]  ;;  %v506_v21 = vld [vmem:[%s4451_s1 + $0xe30] sm:$0xff]  ;;  %v507_v22 = vld [vmem:[%s4451_s1 + $0xe38] sm:$0xff] }
  0xd4   :  { %2765 = vmatprep.subr.bf16.mxu1 %v2764_v18  ;;  %v523_v18 = vld [vmem:[%s4451_s1 + $0xeb8] sm:$0xff]  ;;  %v2790_v19 = vpack.c.bf16 %v505_v15, %v504_v14  ;;  %v524_v23 = vld [vmem:[%s4451_s1 + $0xec0] sm:$0xff]  ;;  %v509_v28 = vld [vmem:[%s4451_s1 + $0xe48] sm:$0xff] }
  0xd5   :  { %2735 = vmatpush3.bf16.msra.mxu0 %v2734_v24  ;;  %v2792_v20 = vpack.c.bf16 %v523_v18, %v522_v17  ;;  %v525_v24 = vld [vmem:[%s4451_s1 + $0xec8] sm:$0xff]  ;;  %v508_v27 = vld [vmem:[%s4451_s1 + $0xe40] sm:$0xff]  ;;  %v526_v29 = vld [vmem:[%s4451_s1 + $0xed0] sm:$0xff]  ;;  %v2852_v18 = vmov 0.0|0.0  }
  0xd6   :  { %2737 = vmatprep.subr.bf16.mxu0 %v2736_v26  ;;  %v2796_v26 = vpack.c.bf16 %v525_v24, %v524_v23  ;;  %v2798_v31 = vpack.c.bf16 %v509_v28, %v508_v27  ;;  %v510_v33 = vld [vmem:[%s4451_s1 + $0xe50] sm:$0xff]  ;;  %v511_v34 = vld [vmem:[%s4451_s1 + $0xe58] sm:$0xff]  ;;  %v528_v35 = vld [vmem:[%s4451_s1 + $0xee0] sm:$0xff] }
  0xd7   :  { %2767 = vmatpush3.bf16.msra.mxu1 %v2766_v25  ;;  %v2794_v25 = vpack.c.bf16 %v507_v22, %v506_v21  ;;  %v512_v39 = vld [vmem:[%s4451_s1 + $0xe60] sm:$0xff]  ;;  %v513_v40 = vld [vmem:[%s4451_s1 + $0xe68] sm:$0xff]  ;;  %v531_v43 = vld [vmem:[%s4451_s1 + $0xef8] sm:$0xff] }
  0xd8   :  { %2769 = vmatprep.subr.bf16.mxu1 %v2768_v30  ;;  %v527_v30 = vld [vmem:[%s4451_s1 + $0xed8] sm:$0xff]  ;;  %v1779_v44 = vld [vmem:[%s4452_s2] ss:$0 sm:$0xff]  ;;  %v514_v52 = vld [vmem:[%s4451_s1 + $0xe70] sm:$0xff] }
  0xd9   :  { %2739 = vmatpush3.bf16.msra.mxu0 %v2738_v36  ;;  %v2800_v32 = vpack.c.bf16 %v527_v30, %v526_v29  ;;  %v529_v36 = vld [vmem:[%s4451_s1 + $0xee8] sm:$0xff]  ;;  %v515_v53 = vld [vmem:[%s4451_s1 + $0xe78] sm:$0xff]  ;;  %v49_v57 = vld [vmem:[%s4450_s0 + $0xe0] sm:$0xff] }
  0xda   :  { %2741 = vmatprep.subr.bf16.mxu0 %v2740_v38  ;;  %v2804_v38 = vpack.c.bf16 %v529_v36, %v528_v35  ;;  %v2810_v56 = vpack.c.bf16 %v515_v53, %v514_v52  ;;  %v1671_v21 = vld [vmem:[%s4453_s3 + $0x10] sm:$0xff]  ;;  %v1672_v22 = vld [vmem:[%s4453_s3 + $0x18] sm:$0xff] }
  0xdb   :  { %2771 = vmatpush3.bf16.msra.mxu1 %v2770_v37  ;;  %v2802_v37 = vpack.c.bf16 %v511_v34, %v510_v33  ;;  %v2816_v23 = vpack.c.bf16 %v1672_v22, %v1671_v21 }
  0xdc   :  { %2773 = vmatprep.subr.bf16.mxu1 %v2772_v42  ;;  %v530_v42 = vld [vmem:[%s4451_s1 + $0xef0] sm:$0xff] }
  0xdd   :  { %2743 = vmatpush3.bf16.msra.mxu0 %v2742_v48  ;;  %v2808_v51 = vpack.c.bf16 %v531_v43, %v530_v42 }
  0xde   :  { %2745 = vmatprep.subr.bf16.mxu0 %v2744_v50 }
  0xdf   :  { %2775 = vmatpush3.bf16.msra.mxu1 %v2774_v49  ;;  %v2806_v49 = vpack.c.bf16 %v513_v40, %v512_v39 }
  0xe0   :  { %2777 = vmatprep.subr.bf16.mxu1 %v2776_v54 }
  0xe1   :  { %2747 = vmatpush3.bf16.msra.mxu0 %v2746_v58 }
  0xe2   :  { %2781 = vmatprep.subr.bf16.mxu0 %v2780_v60 }
  0xe3   :  { %2779 = vmatpush3.bf16.msra.mxu1 %v2778_v59 }
  0xe4   :  { %2316 = vmatprep.subr.mxu1 %v2850_v10  ;;  %1453 = vmatmul.mubr.f32.vlgmr.msra.gmra.mrb[12].mxu0 %v45_v1 }
  0xe5   :  { %2783 = vmatpush3.bf16.msra.mxu0 %v2782_v2  ;;  %1592 = vmatprep.mubr.f32.mxu0 %v50_v9 }
  0xe6   :  { %1523 = vmatmul.mubr.f32.vlgmr.msra.gmra.mrb[12].mxu1 %v47_v3  ;;  %2785 = vmatprep.subr.bf16.mxu0 %v2784_v4 }
  0xe7   :  { %2317 = vmatpush3.msk.msra.mxu1 %vm544_vm0, %v532_v11  ;;  %2318 = vmatprep.mubr.msk.f32.mxu1 %vm2851_vm2, %v2850_v10  ;;  %v1669_v11 = vld [vmem:[%s4453_s3] sm:$0xff] }
  0xe8   :  { %2812 = vmatprep.subr.bf16.mxu1 %v2852_v18 }
  0xe9   :  { %2787 = vmatpush3.bf16.msra.mxu0 %v2786_v12  ;;  %v1670_v12 = vld [vmem:[%s4453_s3 + $0x8] sm:$0xff] }
  0xea   :  { %2319 = vmatmul.mubr.msk.f32.vlgmr.msra.gmra.mrb[14].mxu1 %vm540_vm1, %v51_v16  ;;  %2789 = vmatprep.subr.bf16.mxu0 %v2788_v13  ;;  %v2813_v15 = vpack.c.bf16 %v1670_v12, %v1669_v11 }
  0xeb   :  { %2329 = vmatprep.mubr.msk.f32.mxu1 %vm2851_vm2, %v2850_v10 }
  0xec   :  { %2814 = vmatpush3.bf16.msra.mxu1 %v2813_v15 }
  0xed   :  { %2791 = vmatpush3.bf16.msra.mxu0 %v2790_v19  ;;  %2815 = vmatprep.subr.bf16.mxu1 %v2852_v18 }
  0xee   :  { %2793 = vmatprep.subr.bf16.mxu0 %v2792_v20 }
  0xf0   :  { %2817 = vmatpush3.bf16.msra.mxu1 %v2816_v23 }
  0xf1   :  { %2795 = vmatpush3.bf16.msra.mxu0 %v2794_v25 }
  0xf2   :  { %2797 = vmatprep.subr.bf16.mxu0 %v2796_v26 }
  0xf5   :  { %2799 = vmatpush3.bf16.msra.mxu0 %v2798_v31 }
  0xf6   :  { %2801 = vmatprep.subr.bf16.mxu0 %v2800_v32 }
  0xf7   :  { %v1816_v41 = vpop.f32.mrb[0].mxu0 }
  0xf8   :  { %v1817_v45 = vpop.f32.mrb[1].mxu0 }
  0xf9   :  { %v1851_v46 = vpop.f32.mrb[0].mxu1  ;;  %v1818_v47 = vadd.f32 %v1817_v45, %v1816_v41  ;;  %2803 = vmatpush3.bf16.msra.mxu0 %v2802_v37 }
  0xfa   :  { %v1852_v48 = vpop.f32.mrb[1].mxu1  ;;  %2805 = vmatprep.subr.bf16.mxu0 %v2804_v38 }
  0xfb   :  { %v1853_v50 = vadd.f32 %v1852_v48, %v1851_v46  ;;  %v615_v54 = vadd.f32 %v1818_v47, %v1779_v44 }
  0xfd   :  { %v685_v55 = vadd.f32 %v1853_v50, %v615_v54  ;;  %2807 = vmatpush3.bf16.msra.mxu0 %v2806_v49 }
  0xfe   :  { %2809 = vmatprep.subr.bf16.mxu0 %v2808_v51 }
 0x101   :  { %2811 = vmatpush3.bf16.msra.mxu0 %v2810_v56 }
 0x104   :  { %1593 = vmatmul.mubr.f32.vlgmr.msra.gmra.mrb[14].mxu0 %v49_v57  ;;  %v1782_v57 = vld [vmem:[%s4454_s4] ss:$0 sm:$0xff]  ;;  %s2826_s4 = scalar_lea.vmem %s1772_s26, 128 }
 0x105   :  { %p2827_p0 = scmp.ne.s32.totalorder %s1772_s26, %s2826_s4  ;;  %p2832_p2 = scmp.lt.s32.totalorder %s2826_s4, %s2826_s4 }
 0x107   :  { %p2833_p3 = por %p2832_p2, %p2831_p1 }
 0x109   :  { %p2834_p4 = pnand %p2833_p3, %p2827_p0 }
 0x117   :  { %v1886_v58 = vpop.f32.mrb[2].mxu0 }
 0x118   :  { %v1887_v59 = vpop.f32.mrb[3].mxu0 }
 0x119   :  { %v1921_v60 = vpop.f32.mrb[2].mxu1  ;;  %v1888_v61 = vadd.f32 %v1887_v59, %v1886_v58 }
 0x11a   :  { %v1922_v62 = vpop.f32.mrb[3].mxu1 }
 0x11b   :  { %v1923_v63 = vadd.f32 %v1922_v62, %v1921_v60  ;;  %v755_v0 = vadd.f32 %v1888_v61, %v685_v55 }
 0x11d   :  { %v825_v1 = vadd.f32 %v1923_v63, %v755_v0 }
 0x137   :  { %v1956_v2 = vpop.f32.mrb[4].mxu0 }
 0x138   :  { %v1957_v3 = vpop.f32.mrb[5].mxu0 }
 0x139   :  { %v1991_v4 = vpop.f32.mrb[4].mxu1  ;;  %v1958_v5 = vadd.f32 %v1957_v3, %v1956_v2 }
 0x13a   :  { %v1992_v6 = vpop.f32.mrb[5].mxu1 }
 0x13b   :  { %v1993_v7 = vadd.f32 %v1992_v6, %v1991_v4  ;;  %v895_v8 = vadd.f32 %v1958_v5, %v825_v1 }
 0x13d   :  { %v965_v9 = vadd.f32 %v1993_v7, %v895_v8 }
 0x157   :  { %v2026_v10 = vpop.f32.mrb[6].mxu0 }
 0x158   :  { %v2027_v13 = vpop.f32.mrb[7].mxu0 }
 0x159   :  { %v2061_v14 = vpop.f32.mrb[6].mxu1  ;;  %v2028_v16 = vadd.f32 %v2027_v13, %v2026_v10 }
 0x15a   :  { %v2062_v17 = vpop.f32.mrb[7].mxu1 }
 0x15b   :  { %v2063_v19 = vadd.f32 %v2062_v17, %v2061_v14  ;;  %v1035_v20 = vadd.f32 %v2028_v16, %v965_v9 }
 0x15d   :  { %v1105_v24 = vadd.f32 %v2063_v19, %v1035_v20 }
 0x177   :  { %v2096_v25 = vpop.f32.mrb[8].mxu0 }
 0x178   :  { %v2097_v26 = vpop.f32.mrb[9].mxu0 }
 0x179   :  { %v2131_v27 = vpop.f32.mrb[8].mxu1  ;;  %v2098_v28 = vadd.f32 %v2097_v26, %v2096_v25 }
 0x17a   :  { %v2132_v29 = vpop.f32.mrb[9].mxu1 }
 0x17b   :  { %v2133_v30 = vadd.f32 %v2132_v29, %v2131_v27  ;;  %v1175_v31 = vadd.f32 %v2098_v28, %v1105_v24 }
 0x17d   :  { %v1245_v32 = vadd.f32 %v2133_v30, %v1175_v31 }
 0x197   :  { %v2166_v33 = vpop.f32.mrb[10].mxu0 }
 0x198   :  { %v2167_v34 = vpop.f32.mrb[11].mxu0 }
 0x199   :  { %v2201_v35 = vpop.f32.mrb[10].mxu1  ;;  %v2168_v36 = vadd.f32 %v2167_v34, %v2166_v33 }
 0x19a   :  { %v2202_v37 = vpop.f32.mrb[11].mxu1 }
 0x19b   :  { %v2203_v38 = vadd.f32 %v2202_v37, %v2201_v35  ;;  %v1315_v39 = vadd.f32 %v2168_v36, %v1245_v32 }
 0x19d   :  { %v1385_v40 = vadd.f32 %v2203_v38, %v1315_v39 }
 0x1b7   :  { %v2236_v41 = vpop.f32.mrb[12].mxu0 }
 0x1b8   :  { %v2237_v42 = vpop.f32.mrb[13].mxu0 }
 0x1b9   :  { %v2271_v43 = vpop.f32.mrb[12].mxu1  ;;  %v2238_v44 = vadd.f32 %v2237_v42, %v2236_v41 }
 0x1ba   :  { %v2272_v45 = vpop.f32.mrb[13].mxu1 }
 0x1bb   :  { %v2273_v46 = vadd.f32 %v2272_v45, %v2271_v43  ;;  %v1455_v47 = vadd.f32 %v2238_v44, %v1385_v40 }
 0x1bd   :  { %v1664_v48 = vpop.f32.mrb[14].mxu1  ;;  %v1525_v49 = vadd.f32 %v2273_v46, %v1455_v47 }
 0x1be   :  { %v2320_v50 = vpop.f32.mrb[15].mxu1 }
 0x1d7   :  { %v2306_v51 = vpop.f32.mrb[14].mxu0 }
 0x1d8   :  { %v2307_v52 = vpop.f32.mrb[15].mxu0 }
 0x1d9   :  { %v2308_v53 = vadd.f32 %v2307_v52, %v2306_v51 }
 0x1db   :  { %v1595_v54 = vadd.f32 %v2308_v53, %v1525_v49 }
 0x1dd   :  { %v1665_v55 = vadd.f32 %v1664_v48, %v1595_v54 }
 0x1df   :  { %v1668_v56 = vmax.f32 %v1665_v55, 0.0 }
 0x1e1   :  { %2330 = vmatmul.mubr.msk.f32.vlgmr.msra.gmra.mrb[16].mxu1 %vm1680_vm3, %v1668_v56 }
 0x2b4   :  { %v1750_v58 = vpop.f32.mrb[16].mxu1 }
 0x2b5   :  { %v1751_v59 = vadd.f32 %v1782_v57, %v1750_v58  ;;  %v2331_v60 = vpop.f32.mrb[17].mxu1 }
 0x2b7   :  { %1754 = vmax.xlane.f32.xlu0 %v1751_v59 }
 0x344   :  { %v1755_v61 = vpop.xlane.xlu0 %1754 }
 0x345   :  { %v1756_v62 = vsub.f32 %v1751_v59, %v1755_v61 }
 0x347   :  { %v1757_v63 = vmul.f32 1.442695, %v1756_v62 }
 0x349   :  { %2822 = vpow2.f32 %v1757_v63 }
 0x353   :  { %v2823_v0 = vpop.eup %2822 }
 0x354   :  { %1759 = vadd.xlane.f32.xlu0 %v2823_v0 }
 0x3e1   :  { %v1760_v1 = vpop.xlane.xlu0 %1759 }
 0x3e2   :  { %2824 = vlog2.f32 %v1760_v1 }
 0x3ec   :  { %v2825_v2 = vpop.eup %2824 }
 0x3ed   :  { %v1762_v3 = vmul.f32 0.6931472, %v2825_v2 }
 0x3ef   :  { %v1763_v4 = vsub.f32 %v1756_v62, %v1762_v3 }
 0x3f1   :  { %1764 = vst [vmem:[#allocation2] sm:$0xff] %v1763_v4 }
 0x3f2   :  { %2837 = shalt.err (!%p2834_p4)
}
 0x3f3   :  { %s2838_s29 = scalar_lea.hbm %s4455_s5, 128 }
 0x3f4   :  { %p2839_p5 = scmp.ne.s32.totalorder %s4455_s5, %s2838_s29  ;;  %p2842_p6 = scmp.lt.u32.totalorder %s2838_s29, %s4455_s5 }
 0x3f6   :  { %p2844_p7 = pnand %p2842_p6, %p2839_p5 }
 0x3f8   :  { %2847 = shalt.err (!%p2844_p7)
}
 0x3f9   :  { %1774 = dma.vmem_to_hbm [thread:$0]  %s1772_s26, 128, %s4455_s5, [#allocation3]  }
 0x3fa   :  { %2848 = dma.done.wait [#allocation3], 128  }
 0x3fb   :  { %2849 = vsyncadd [#allocation3], 4294967168 }
 0x3fc   :  { %1778 = vsyncpa [#allocation3], 1 }

</bundles_post_ra>
